<compile_context>
chip_gen: v7x
topology: tpu7x:2x2x1
jax: 0.10.0
libtpu: 0.0.40
codegen_flags: <defaults>
</compile_context>

<pallas_src>
import numpy as np
import jax
import jax.numpy as jnp
from jax.experimental import pallas as pl
from jax.experimental.pallas import tpu as pltpu

# ----------------------------- configuration --------------------------------
N_BATCH = 2
T_LEN = 8
C_IN, H_IN, W_IN = 3, 16, 16
FRAME_FLAT = C_IN * H_IN * W_IN      # 768
FEAT_DIM = 464 * 2 * 3               # 2784 (ShuffleNet stage4 flattened)
D_MODEL = 32
D_INNER = 64
N_HEAD = 4
D_K = 8
D_V = 8
N_LAYERS = 2
LN_EPS = 1e-5
NEG_INF = -1e30                      # finite "minus infinity" (avoids NaN rows)
INV_TEMP = 1.0 / float(np.sqrt(D_K))

Q_SZ = N_HEAD * D_K                  # 32
QKV_SZ = 3 * Q_SZ                    # 96

# packed bias/LN-vector row layout (one (19,128) f32 operand)
ROW_B_IN, ROW_LN_IN_G, ROW_LN_IN_B = 0, 1, 2
LAYER_ROW_BASE = 3
LAYER_ROWS = 8                       # bqkv, bo, ln1_g, ln1_b, b1, b2, ln2_g, ln2_b
N_PVEC_ROWS = LAYER_ROW_BASE + N_LAYERS * LAYER_ROWS   # 19


# ------------------------------ fused kernel ---------------------------------
def _layer_norm(x, g, b):
    mu = jnp.mean(x, axis=-1, keepdims=True)
    var = jnp.mean(jnp.square(x - mu), axis=-1, keepdims=True)
    return (x - mu) * jax.lax.rsqrt(var + LN_EPS) * g + b


def _encoder_kernel(frames_ref, w_in_ref, pe_ref, npad_ref, attn_bias_ref,
                    w_qkv_ref, wo_ref, w1_ref, w2_ref, pvec_ref, out_ref):
    f32 = jnp.float32
    bf16 = jnp.bfloat16

    # all tiny bias / LayerNorm vectors, loaded once, sliced statically
    P = pvec_ref[...]                                     # (19, 128) f32

    def prow(r, width):
        return P[r:r + 1, 0:width]                        # (1, width)

    # ---- stem: folded (feature_extractor o fc) projection + LayerNorm + PE ---
    vf = jnp.dot(frames_ref[...], w_in_ref[...],
                 preferred_element_type=f32) + prow(ROW_B_IN, D_MODEL)
    x = _layer_norm(vf, prow(ROW_LN_IN_G, D_MODEL),
                    prow(ROW_LN_IN_B, D_MODEL)) + pe_ref[...]

    npad = npad_ref[...]              # (NT, 1)  non-pad mask (per query row)
    attn_bias = attn_bias_ref[...]    # (NT, NT) additive mask: 0 valid, -1e30 else

    for i in range(N_LAYERS):
        base = LAYER_ROW_BASE + i * LAYER_ROWS
        bqkv = prow(base + 0, QKV_SZ)
        bo = prow(base + 1, D_MODEL)
        ln1_g, ln1_b = prow(base + 2, D_MODEL), prow(base + 3, D_MODEL)
        b1 = prow(base + 4, D_INNER)
        b2 = prow(base + 5, D_MODEL)
        ln2_g, ln2_b = prow(base + 6, D_MODEL), prow(base + 7, D_MODEL)

        # ----------------- multi-head self-attention -------------------------
        residual = x
        # one lane-dense fused QKV projection per layer (1/temp folded into q)
        qkv = jnp.dot(x.astype(bf16), w_qkv_ref[i],
                      preferred_element_type=f32) + bqkv          # (NT, 96) f32

        heads = []
        for h in range(N_HEAD):
            q = qkv[:, h * D_K:(h + 1) * D_K]
            k = qkv[:, Q_SZ + h * D_K:Q_SZ + (h + 1) * D_K]
            v = qkv[:, 2 * Q_SZ + h * D_V:2 * Q_SZ + (h + 1) * D_V]
            # scores over the joint (batch-flattened) key axis; cross-batch and
            # padded keys are suppressed by the additive bias.
            s = jax.lax.dot_general(q.astype(bf16), k.astype(bf16),
                                    (((1,), (1,)), ((), ())),
                                    preferred_element_type=f32) + attn_bias
            s = s - jnp.max(s, axis=-1, keepdims=True)
            p = jnp.exp(s)
            p = p * pl.reciprocal(jnp.sum(p, axis=-1, keepdims=True), approx=True)
            heads.append(jnp.dot(p.astype(bf16), v.astype(bf16),
                                 preferred_element_type=f32))      # (NT, D_V)

        cat = jnp.concatenate(heads, axis=-1)                      # (NT, D_MODEL)
        attn_out = jnp.dot(cat.astype(bf16), wo_ref[i],
                           preferred_element_type=f32) + bo
        x = _layer_norm(attn_out + residual, ln1_g, ln1_b) * npad

        # ----------------- position-wise feed-forward ------------------------
        residual = x
        hid = jnp.maximum(
            jnp.dot(x.astype(bf16), w1_ref[i],
                    preferred_element_type=f32) + b1, 0.0)
        ff = jnp.dot(hid.astype(bf16), w2_ref[i],
                     preferred_element_type=f32) + b2
        x = _layer_norm(ff + residual, ln2_g, ln2_b) * npad

    out_ref[...] = x


# ------------------------------- model pieces --------------------------------
def positional_encoding_table(t_len, d_model):
    pos = np.arange(t_len, dtype=np.float32)[:, None]
    div = np.exp(np.arange(0, d_model, 2, dtype=np.float32)
                 * -(np.log(10000.0) / d_model))
    pe = np.zeros((t_len, d_model), dtype=np.float32)
    pe[:, 0::2] = np.sin(pos * div)
    pe[:, 1::2] = np.cos(pos * div)
    return jnp.asarray(pe)


def video_encoder_forward(packed, padded_input, input_lengths):
    nb, t = padded_input.shape[:2]
    nt = nb * t
    frames = padded_input.reshape(nt, FRAME_FLAT).astype(jnp.bfloat16)

    # tiny mask / positional-encoding prep (fused by XLA around the kernel)
    pos = jnp.arange(t)
    valid = pos[None, :] < input_lengths[:, None]                 # (N, T) bool
    npad = valid.reshape(nt, 1).astype(jnp.float32)               # (NT, 1)
    key_valid = valid.reshape(nt)                                 # (NT,)
    row_batch = jnp.repeat(jnp.arange(nb), t)                     # (NT,)
    same_batch = row_batch[:, None] == row_batch[None, :]         # (NT, NT)
    attn_bias = jnp.where(same_batch & key_valid[None, :], 0.0,
                          NEG_INF).astype(jnp.float32)            # (NT, NT)
    pe = jnp.tile(positional_encoding_table(t, D_MODEL), (nb, 1)) # (NT, D)

    out = pl.pallas_call(
        _encoder_kernel,
        out_shape=jax.ShapeDtypeStruct((nt, D_MODEL), jnp.float32),
    )(frames, packed["w_in"], pe, npad, attn_bias,
      packed["w_qkv"], packed["wo"], packed["w1"], packed["w2"],
      packed["pvec"])
    return out.reshape(nb, t, D_MODEL)


# ------------------------------ parameter init -------------------------------
def init_params(key):
    keys = iter(jax.random.split(key, 32))

    def nrm(shape, fan_in):
        return (jax.random.normal(next(keys), shape, jnp.float32)
                / np.sqrt(float(fan_in)))

    params = {
        # stand-in for the ShuffleNet feature extractor (linear) + fc layer
        "w_feat": nrm((FRAME_FLAT, FEAT_DIM), FRAME_FLAT),
        "b_feat": jnp.zeros((FEAT_DIM,), jnp.float32),
        "w_fc": nrm((FEAT_DIM, D_MODEL), FEAT_DIM),
        "b_fc": jnp.zeros((D_MODEL,), jnp.float32),
        "ln_in_g": jnp.ones((D_MODEL,), jnp.float32),
        "ln_in_b": jnp.zeros((D_MODEL,), jnp.float32),
        "layers": [],
    }
    for _ in range(N_LAYERS):
        lp = {
            "w_qs": nrm((D_MODEL, N_HEAD * D_K), D_MODEL),
            "b_qs": jnp.zeros((N_HEAD * D_K,), jnp.float32),
            "w_ks": nrm((D_MODEL, N_HEAD * D_K), D_MODEL),
            "b_ks": jnp.zeros((N_HEAD * D_K,), jnp.float32),
            "w_vs": nrm((D_MODEL, N_HEAD * D_V), D_MODEL),
            "b_vs": jnp.zeros((N_HEAD * D_V,), jnp.float32),
            "w_o": nrm((N_HEAD * D_V, D_MODEL), N_HEAD * D_V),
            "b_o": jnp.zeros((D_MODEL,), jnp.float32),
            "ln1_g": jnp.ones((D_MODEL,), jnp.float32),
            "ln1_b": jnp.zeros((D_MODEL,), jnp.float32),
            "w1": nrm((D_MODEL, D_INNER), D_MODEL),
            "b1": jnp.zeros((D_INNER,), jnp.float32),
            "w2": nrm((D_INNER, D_MODEL), D_INNER),
            "b2": jnp.zeros((D_MODEL,), jnp.float32),
            "ln2_g": jnp.ones((D_MODEL,), jnp.float32),
            "ln2_b": jnp.zeros((D_MODEL,), jnp.float32),
        }
        params["layers"].append(lp)
    return params


def pack_params(params):
    """One-time host-side prep (off the hot path):
       - fold (feature_extractor o fc) into one (768, 32) weight,
       - fuse per-layer w_q|w_k|w_v into (32, 96) with 1/sqrt(d_k) folded in,
       - cast all matmul weights to bf16,
       - pack every tiny bias / LayerNorm vector into one (19, 128) f32 array."""
    bf16 = jnp.bfloat16
    f32 = jnp.float32

    # fold: frames @ w_feat @ w_fc  ==  frames @ (w_feat @ w_fc)
    w_in = (params["w_feat"] @ params["w_fc"]).astype(bf16)        # (768, 32)
    b_in = params["b_feat"] @ params["w_fc"] + params["b_fc"]      # (32,)

    def row(vec):
        r = jnp.zeros((128,), f32)
        return r.at[:vec.shape[0]].set(vec.astype(f32))

    rows = [row(b_in), row(params["ln_in_g"]), row(params["ln_in_b"])]

    w_qkv, wo, w1, w2 = [], [], [], []
    for lp in params["layers"]:
        wq = lp["w_qs"] * INV_TEMP          # fold 1/temperature into q proj
        bq = lp["b_qs"] * INV_TEMP
        w_qkv.append(jnp.concatenate([wq, lp["w_ks"], lp["w_vs"]], axis=1))
        wo.append(lp["w_o"])
        w1.append(lp["w1"])
        w2.append(lp["w2"])
        rows += [
            row(jnp.concatenate([bq, lp["b_ks"], lp["b_vs"]])),    # bqkv (96,)
            row(lp["b_o"]),
            row(lp["ln1_g"]), row(lp["ln1_b"]),
            row(lp["b1"]), row(lp["b2"]),
            row(lp["ln2_g"]), row(lp["ln2_b"]),
        ]

    pvec = jnp.stack(rows)                                          # (19, 128)
    assert pvec.shape == (N_PVEC_ROWS, 128)

    return {
        "w_in": w_in,
        "w_qkv": jnp.stack(w_qkv).astype(bf16),   # (L, 32, 96)
        "wo": jnp.stack(wo).astype(bf16),         # (L, 32, 32)
        "w1": jnp.stack(w1).astype(bf16),         # (L, 32, 64)
        "w2": jnp.stack(w2).astype(bf16),         # (L, 64, 32)
        "pvec": pvec,                              # (19, 128) f32
    }


# ----------------------------------- main ------------------------------------
if __name__ == "__main__":
    key = jax.random.PRNGKey(0)
    k_in, k_par = jax.random.split(key)

    padded_input = jax.random.normal(
        k_in, (N_BATCH, T_LEN, C_IN, H_IN, W_IN), jnp.float32)
    input_lengths = jnp.array([T_LEN, T_LEN - 3], dtype=jnp.int32)

    params = init_params(k_par)
    packed = pack_params(params)          # one-time fold/stack, off the hot path

    fwd = jax.jit(video_encoder_forward)
    enc_output = fwd(packed, padded_input, input_lengths)
    enc_output = jax.block_until_ready(enc_output)

    assert enc_output.shape == (N_BATCH, T_LEN, D_MODEL)
    assert bool(jnp.all(jnp.isfinite(enc_output)))
    print("KERNEL_OK")
</pallas_src>

<mosaic_0001>
module attributes {stable_mosaic.version = 11 : i64} {
  func.func @_encoder_kernel(%arg0: memref<16x768xbf16, #tpu.memory_space<vmem>>, %arg1: memref<768x32xbf16, #tpu.memory_space<vmem>>, %arg2: memref<16x32xf32, #tpu.memory_space<vmem>>, %arg3: memref<16x1xf32, #tpu.memory_space<vmem>>, %arg4: memref<16x16xf32, #tpu.memory_space<vmem>>, %arg5: memref<2x32x96xbf16, #tpu.memory_space<vmem>>, %arg6: memref<2x32x32xbf16, #tpu.memory_space<vmem>>, %arg7: memref<2x32x64xbf16, #tpu.memory_space<vmem>>, %arg8: memref<2x64x32xbf16, #tpu.memory_space<vmem>>, %arg9: memref<19x128xf32, #tpu.memory_space<vmem>>, %arg10: memref<16x32xf32, #tpu.memory_space<vmem>>) attributes {dimension_semantics = [], scalar_prefetch = 0 : i64, scratch_operands = 0 : i64, tpu.core_type = #tpu.core_type<tc>} {
    %c0 = arith.constant 0 : index
    %c0_0 = arith.constant 0 : index
    %0 = vector.load %arg9[%c0, %c0_0] : memref<19x128xf32, #tpu.memory_space<vmem>>, vector<19x128xf32>
    %c0_1 = arith.constant 0 : index
    %c0_2 = arith.constant 0 : index
    %1 = vector.load %arg0[%c0_1, %c0_2] : memref<16x768xbf16, #tpu.memory_space<vmem>>, vector<16x768xbf16>
    %c0_3 = arith.constant 0 : index
    %c0_4 = arith.constant 0 : index
    %2 = vector.load %arg1[%c0_3, %c0_4] : memref<768x32xbf16, #tpu.memory_space<vmem>>, vector<768x32xbf16>
    %cst = arith.constant dense<0.000000e+00> : vector<16x32xf32>
    %3 = tpu.matmul %1, %2, %cst {dimension_numbers = #tpu.dot_dimension_numbers<[1], [0], [0], [1], [0, 0, 1, 1], [], []>} : vector<16x768xbf16>, vector<768x32xbf16>, vector<16x32xf32> -> vector<16x32xf32>
    %4 = vector.extract_strided_slice %0 {offsets = [0, 0], sizes = [1, 32], strides = [1, 1]} : vector<19x128xf32> to vector<1x32xf32>
    %5 = vector.broadcast %4 : vector<1x32xf32> to vector<16x32xf32>
    %6 = arith.addf %3, %5 : vector<16x32xf32>
    %7 = vector.extract_strided_slice %0 {offsets = [1, 0], sizes = [1, 32], strides = [1, 1]} : vector<19x128xf32> to vector<1x32xf32>
    %8 = vector.extract_strided_slice %0 {offsets = [2, 0], sizes = [1, 32], strides = [1, 1]} : vector<19x128xf32> to vector<1x32xf32>
    %cst_5 = arith.constant dense<0.000000e+00> : vector<16xf32>
    %9 = vector.multi_reduction <add>, %6, %cst_5 [1] : vector<16x32xf32> to vector<16xf32>
    %10 = vector.shape_cast %9 : vector<16xf32> to vector<16x1xf32>
    %cst_6 = arith.constant 3.200000e+01 : f32
    %11 = vector.broadcast %cst_6 : f32 to vector<16x1xf32>
    %12 = arith.divf %10, %11 : vector<16x1xf32>
    %13 = vector.broadcast %12 : vector<16x1xf32> to vector<16x32xf32>
    %14 = arith.subf %6, %13 : vector<16x32xf32>
    %15 = arith.mulf %14, %14 : vector<16x32xf32>
    %cst_7 = arith.constant dense<0.000000e+00> : vector<16xf32>
    %16 = vector.multi_reduction <add>, %15, %cst_7 [1] : vector<16x32xf32> to vector<16xf32>
    %17 = vector.shape_cast %16 : vector<16xf32> to vector<16x1xf32>
    %cst_8 = arith.constant 3.200000e+01 : f32
    %18 = vector.broadcast %cst_8 : f32 to vector<16x1xf32>
    %19 = arith.divf %17, %18 : vector<16x1xf32>
    %20 = vector.broadcast %12 : vector<16x1xf32> to vector<16x32xf32>
    %21 = arith.subf %6, %20 : vector<16x32xf32>
    %cst_9 = arith.constant 9.99999974E-6 : f32
    %22 = vector.broadcast %cst_9 : f32 to vector<16x1xf32>
    %23 = arith.addf %19, %22 : vector<16x1xf32>
    %24 = math.rsqrt %23 : vector<16x1xf32>
    %25 = vector.broadcast %24 : vector<16x1xf32> to vector<16x32xf32>
    %26 = arith.mulf %21, %25 : vector<16x32xf32>
    %27 = vector.broadcast %7 : vector<1x32xf32> to vector<16x32xf32>
    %28 = arith.mulf %26, %27 : vector<16x32xf32>
    %29 = vector.broadcast %8 : vector<1x32xf32> to vector<16x32xf32>
    %30 = arith.addf %28, %29 : vector<16x32xf32>
    %c0_10 = arith.constant 0 : index
    %c0_11 = arith.constant 0 : index
    %31 = vector.load %arg2[%c0_10, %c0_11] : memref<16x32xf32, #tpu.memory_space<vmem>>, vector<16x32xf32>
    %32 = arith.addf %30, %31 : vector<16x32xf32>
    %c0_12 = arith.constant 0 : index
    %c0_13 = arith.constant 0 : index
    %33 = vector.load %arg3[%c0_12, %c0_13] : memref<16x1xf32, #tpu.memory_space<vmem>>, vector<16x1xf32>
    %c0_14 = arith.constant 0 : index
    %c0_15 = arith.constant 0 : index
    %34 = vector.load %arg4[%c0_14, %c0_15] : memref<16x16xf32, #tpu.memory_space<vmem>>, vector<16x16xf32>
    %35 = vector.extract_strided_slice %0 {offsets = [3, 0], sizes = [1, 96], strides = [1, 1]} : vector<19x128xf32> to vector<1x96xf32>
    %36 = vector.extract_strided_slice %0 {offsets = [4, 0], sizes = [1, 32], strides = [1, 1]} : vector<19x128xf32> to vector<1x32xf32>
    %37 = vector.extract_strided_slice %0 {offsets = [5, 0], sizes = [1, 32], strides = [1, 1]} : vector<19x128xf32> to vector<1x32xf32>
    %38 = vector.extract_strided_slice %0 {offsets = [6, 0], sizes = [1, 32], strides = [1, 1]} : vector<19x128xf32> to vector<1x32xf32>
    %39 = vector.extract_strided_slice %0 {offsets = [7, 0], sizes = [1, 64], strides = [1, 1]} : vector<19x128xf32> to vector<1x64xf32>
    %40 = vector.extract_strided_slice %0 {offsets = [8, 0], sizes = [1, 32], strides = [1, 1]} : vector<19x128xf32> to vector<1x32xf32>
    %41 = vector.extract_strided_slice %0 {offsets = [9, 0], sizes = [1, 32], strides = [1, 1]} : vector<19x128xf32> to vector<1x32xf32>
    %42 = vector.extract_strided_slice %0 {offsets = [10, 0], sizes = [1, 32], strides = [1, 1]} : vector<19x128xf32> to vector<1x32xf32>
    %43 = arith.truncf %32 : vector<16x32xf32> to vector<16x32xbf16>
    %c0_16 = arith.constant 0 : index
    %c0_17 = arith.constant 0 : index
    %c0_18 = arith.constant 0 : index
    %44 = vector.load %arg5[%c0_16, %c0_17, %c0_18] : memref<2x32x96xbf16, #tpu.memory_space<vmem>>, vector<1x32x96xbf16>
    %45 = vector.shape_cast %44 : vector<1x32x96xbf16> to vector<32x96xbf16>
    %cst_19 = arith.constant dense<0.000000e+00> : vector<16x96xf32>
    %46 = tpu.matmul %43, %45, %cst_19 {dimension_numbers = #tpu.dot_dimension_numbers<[1], [0], [0], [1], [0, 0, 1, 1], [], []>} : vector<16x32xbf16>, vector<32x96xbf16>, vector<16x96xf32> -> vector<16x96xf32>
    %47 = vector.broadcast %35 : vector<1x96xf32> to vector<16x96xf32>
    %48 = arith.addf %46, %47 : vector<16x96xf32>
    %49 = vector.extract_strided_slice %48 {offsets = [0, 0], sizes = [16, 8], strides = [1, 1]} : vector<16x96xf32> to vector<16x8xf32>
    %50 = vector.extract_strided_slice %48 {offsets = [0, 32], sizes = [16, 8], strides = [1, 1]} : vector<16x96xf32> to vector<16x8xf32>
    %51 = vector.extract_strided_slice %48 {offsets = [0, 64], sizes = [16, 8], strides = [1, 1]} : vector<16x96xf32> to vector<16x8xf32>
    %52 = arith.truncf %49 : vector<16x8xf32> to vector<16x8xbf16>
    %53 = arith.truncf %50 : vector<16x8xf32> to vector<16x8xbf16>
    %cst_20 = arith.constant dense<0.000000e+00> : vector<16x16xf32>
    %54 = tpu.matmul %52, %53, %cst_20 {dimension_numbers = #tpu.dot_dimension_numbers<[1], [1], [0], [0], [0, 0, 1, 0], [], []>} : vector<16x8xbf16>, vector<16x8xbf16>, vector<16x16xf32> -> vector<16x16xf32>
    %55 = arith.addf %54, %34 : vector<16x16xf32>
    %cst_21 = arith.constant dense<0xFF800000> : vector<16xf32>
    %56 = vector.multi_reduction <maximumf>, %55, %cst_21 [1] : vector<16x16xf32> to vector<16xf32>
    %57 = vector.shape_cast %56 : vector<16xf32> to vector<16x1xf32>
    %58 = vector.broadcast %57 : vector<16x1xf32> to vector<16x16xf32>
    %59 = arith.subf %55, %58 : vector<16x16xf32>
    %60 = math.exp %59 : vector<16x16xf32>
    %cst_22 = arith.constant dense<0.000000e+00> : vector<16xf32>
    %61 = vector.multi_reduction <add>, %60, %cst_22 [1] : vector<16x16xf32> to vector<16xf32>
    %62 = vector.shape_cast %61 : vector<16xf32> to vector<16x1xf32>
    %63 = tpu.reciprocal %62 {approx = true} : vector<16x1xf32> -> vector<16x1xf32>
    %64 = vector.broadcast %63 : vector<16x1xf32> to vector<16x16xf32>
    %65 = arith.mulf %60, %64 : vector<16x16xf32>
    %66 = arith.truncf %65 : vector<16x16xf32> to vector<16x16xbf16>
    %67 = arith.truncf %51 : vector<16x8xf32> to vector<16x8xbf16>
    %cst_23 = arith.constant dense<0.000000e+00> : vector<16x8xf32>
    %68 = tpu.matmul %66, %67, %cst_23 {dimension_numbers = #tpu.dot_dimension_numbers<[1], [0], [0], [1], [0, 0, 1, 1], [], []>} : vector<16x16xbf16>, vector<16x8xbf16>, vector<16x8xf32> -> vector<16x8xf32>
    %69 = vector.extract_strided_slice %48 {offsets = [0, 8], sizes = [16, 8], strides = [1, 1]} : vector<16x96xf32> to vector<16x8xf32>
    %70 = vector.extract_strided_slice %48 {offsets = [0, 40], sizes = [16, 8], strides = [1, 1]} : vector<16x96xf32> to vector<16x8xf32>
    %71 = vector.extract_strided_slice %48 {offsets = [0, 72], sizes = [16, 8], strides = [1, 1]} : vector<16x96xf32> to vector<16x8xf32>
    %72 = arith.truncf %69 : vector<16x8xf32> to vector<16x8xbf16>
    %73 = arith.truncf %70 : vector<16x8xf32> to vector<16x8xbf16>
    %cst_24 = arith.constant dense<0.000000e+00> : vector<16x16xf32>
    %74 = tpu.matmul %72, %73, %cst_24 {dimension_numbers = #tpu.dot_dimension_numbers<[1], [1], [0], [0], [0, 0, 1, 0], [], []>} : vector<16x8xbf16>, vector<16x8xbf16>, vector<16x16xf32> -> vector<16x16xf32>
    %75 = arith.addf %74, %34 : vector<16x16xf32>
    %cst_25 = arith.constant dense<0xFF800000> : vector<16xf32>
    %76 = vector.multi_reduction <maximumf>, %75, %cst_25 [1] : vector<16x16xf32> to vector<16xf32>
    %77 = vector.shape_cast %76 : vector<16xf32> to vector<16x1xf32>
    %78 = vector.broadcast %77 : vector<16x1xf32> to vector<16x16xf32>
    %79 = arith.subf %75, %78 : vector<16x16xf32>
    %80 = math.exp %79 : vector<16x16xf32>
    %cst_26 = arith.constant dense<0.000000e+00> : vector<16xf32>
    %81 = vector.multi_reduction <add>, %80, %cst_26 [1] : vector<16x16xf32> to vector<16xf32>
    %82 = vector.shape_cast %81 : vector<16xf32> to vector<16x1xf32>
    %83 = tpu.reciprocal %82 {approx = true} : vector<16x1xf32> -> vector<16x1xf32>
    %84 = vector.broadcast %83 : vector<16x1xf32> to vector<16x16xf32>
    %85 = arith.mulf %80, %84 : vector<16x16xf32>
    %86 = arith.truncf %85 : vector<16x16xf32> to vector<16x16xbf16>
    %87 = arith.truncf %71 : vector<16x8xf32> to vector<16x8xbf16>
    %cst_27 = arith.constant dense<0.000000e+00> : vector<16x8xf32>
    %88 = tpu.matmul %86, %87, %cst_27 {dimension_numbers = #tpu.dot_dimension_numbers<[1], [0], [0], [1], [0, 0, 1, 1], [], []>} : vector<16x16xbf16>, vector<16x8xbf16>, vector<16x8xf32> -> vector<16x8xf32>
    %89 = vector.extract_strided_slice %48 {offsets = [0, 16], sizes = [16, 8], strides = [1, 1]} : vector<16x96xf32> to vector<16x8xf32>
    %90 = vector.extract_strided_slice %48 {offsets = [0, 48], sizes = [16, 8], strides = [1, 1]} : vector<16x96xf32> to vector<16x8xf32>
    %91 = vector.extract_strided_slice %48 {offsets = [0, 80], sizes = [16, 8], strides = [1, 1]} : vector<16x96xf32> to vector<16x8xf32>
    %92 = arith.truncf %89 : vector<16x8xf32> to vector<16x8xbf16>
    %93 = arith.truncf %90 : vector<16x8xf32> to vector<16x8xbf16>
    %cst_28 = arith.constant dense<0.000000e+00> : vector<16x16xf32>
    %94 = tpu.matmul %92, %93, %cst_28 {dimension_numbers = #tpu.dot_dimension_numbers<[1], [1], [0], [0], [0, 0, 1, 0], [], []>} : vector<16x8xbf16>, vector<16x8xbf16>, vector<16x16xf32> -> vector<16x16xf32>
    %95 = arith.addf %94, %34 : vector<16x16xf32>
    %cst_29 = arith.constant dense<0xFF800000> : vector<16xf32>
    %96 = vector.multi_reduction <maximumf>, %95, %cst_29 [1] : vector<16x16xf32> to vector<16xf32>
    %97 = vector.shape_cast %96 : vector<16xf32> to vector<16x1xf32>
    %98 = vector.broadcast %97 : vector<16x1xf32> to vector<16x16xf32>
    %99 = arith.subf %95, %98 : vector<16x16xf32>
    %100 = math.exp %99 : vector<16x16xf32>
    %cst_30 = arith.constant dense<0.000000e+00> : vector<16xf32>
    %101 = vector.multi_reduction <add>, %100, %cst_30 [1] : vector<16x16xf32> to vector<16xf32>
    %102 = vector.shape_cast %101 : vector<16xf32> to vector<16x1xf32>
    %103 = tpu.reciprocal %102 {approx = true} : vector<16x1xf32> -> vector<16x1xf32>
    %104 = vector.broadcast %103 : vector<16x1xf32> to vector<16x16xf32>
    %105 = arith.mulf %100, %104 : vector<16x16xf32>
    %106 = arith.truncf %105 : vector<16x16xf32> to vector<16x16xbf16>
    %107 = arith.truncf %91 : vector<16x8xf32> to vector<16x8xbf16>
    %cst_31 = arith.constant dense<0.000000e+00> : vector<16x8xf32>
    %108 = tpu.matmul %106, %107, %cst_31 {dimension_numbers = #tpu.dot_dimension_numbers<[1], [0], [0], [1], [0, 0, 1, 1], [], []>} : vector<16x16xbf16>, vector<16x8xbf16>, vector<16x8xf32> -> vector<16x8xf32>
    %109 = vector.extract_strided_slice %48 {offsets = [0, 24], sizes = [16, 8], strides = [1, 1]} : vector<16x96xf32> to vector<16x8xf32>
    %110 = vector.extract_strided_slice %48 {offsets = [0, 56], sizes = [16, 8], strides = [1, 1]} : vector<16x96xf32> to vector<16x8xf32>
    %111 = vector.extract_strided_slice %48 {offsets = [0, 88], sizes = [16, 8], strides = [1, 1]} : vector<16x96xf32> to vector<16x8xf32>
    %112 = arith.truncf %109 : vector<16x8xf32> to vector<16x8xbf16>
    %113 = arith.truncf %110 : vector<16x8xf32> to vector<16x8xbf16>
    %cst_32 = arith.constant dense<0.000000e+00> : vector<16x16xf32>
    %114 = tpu.matmul %112, %113, %cst_32 {dimension_numbers = #tpu.dot_dimension_numbers<[1], [1], [0], [0], [0, 0, 1, 0], [], []>} : vector<16x8xbf16>, vector<16x8xbf16>, vector<16x16xf32> -> vector<16x16xf32>
    %115 = arith.addf %114, %34 : vector<16x16xf32>
    %cst_33 = arith.constant dense<0xFF800000> : vector<16xf32>
    %116 = vector.multi_reduction <maximumf>, %115, %cst_33 [1] : vector<16x16xf32> to vector<16xf32>
    %117 = vector.shape_cast %116 : vector<16xf32> to vector<16x1xf32>
    %118 = vector.broadcast %117 : vector<16x1xf32> to vector<16x16xf32>
    %119 = arith.subf %115, %118 : vector<16x16xf32>
    %120 = math.exp %119 : vector<16x16xf32>
    %cst_34 = arith.constant dense<0.000000e+00> : vector<16xf32>
    %121 = vector.multi_reduction <add>, %120, %cst_34 [1] : vector<16x16xf32> to vector<16xf32>
    %122 = vector.shape_cast %121 : vector<16xf32> to vector<16x1xf32>
    %123 = tpu.reciprocal %122 {approx = true} : vector<16x1xf32> -> vector<16x1xf32>
    %124 = vector.broadcast %123 : vector<16x1xf32> to vector<16x16xf32>
    %125 = arith.mulf %120, %124 : vector<16x16xf32>
    %126 = arith.truncf %125 : vector<16x16xf32> to vector<16x16xbf16>
    %127 = arith.truncf %111 : vector<16x8xf32> to vector<16x8xbf16>
    %cst_35 = arith.constant dense<0.000000e+00> : vector<16x8xf32>
    %128 = tpu.matmul %126, %127, %cst_35 {dimension_numbers = #tpu.dot_dimension_numbers<[1], [0], [0], [1], [0, 0, 1, 1], [], []>} : vector<16x16xbf16>, vector<16x8xbf16>, vector<16x8xf32> -> vector<16x8xf32>
    %129 = tpu.concatenate %68, %88, %108, %128 in 1 : vector<16x8xf32>, vector<16x8xf32>, vector<16x8xf32>, vector<16x8xf32> -> vector<16x32xf32>
    %130 = arith.truncf %129 : vector<16x32xf32> to vector<16x32xbf16>
    %c0_36 = arith.constant 0 : index
    %c0_37 = arith.constant 0 : index
    %c0_38 = arith.constant 0 : index
    %131 = vector.load %arg6[%c0_36, %c0_37, %c0_38] : memref<2x32x32xbf16, #tpu.memory_space<vmem>>, vector<1x32x32xbf16>
    %132 = vector.shape_cast %131 : vector<1x32x32xbf16> to vector<32x32xbf16>
    %cst_39 = arith.constant dense<0.000000e+00> : vector<16x32xf32>
    %133 = tpu.matmul %130, %132, %cst_39 {dimension_numbers = #tpu.dot_dimension_numbers<[1], [0], [0], [1], [0, 0, 1, 1], [], []>} : vector<16x32xbf16>, vector<32x32xbf16>, vector<16x32xf32> -> vector<16x32xf32>
    %134 = vector.broadcast %36 : vector<1x32xf32> to vector<16x32xf32>
    %135 = arith.addf %133, %134 : vector<16x32xf32>
    %136 = arith.addf %135, %32 : vector<16x32xf32>
    %cst_40 = arith.constant dense<0.000000e+00> : vector<16xf32>
    %137 = vector.multi_reduction <add>, %136, %cst_40 [1] : vector<16x32xf32> to vector<16xf32>
    %138 = vector.shape_cast %137 : vector<16xf32> to vector<16x1xf32>
    %cst_41 = arith.constant 3.200000e+01 : f32
    %139 = vector.broadcast %cst_41 : f32 to vector<16x1xf32>
    %140 = arith.divf %138, %139 : vector<16x1xf32>
    %141 = vector.broadcast %140 : vector<16x1xf32> to vector<16x32xf32>
    %142 = arith.subf %136, %141 : vector<16x32xf32>
    %143 = arith.mulf %142, %142 : vector<16x32xf32>
    %cst_42 = arith.constant dense<0.000000e+00> : vector<16xf32>
    %144 = vector.multi_reduction <add>, %143, %cst_42 [1] : vector<16x32xf32> to vector<16xf32>
    %145 = vector.shape_cast %144 : vector<16xf32> to vector<16x1xf32>
    %cst_43 = arith.constant 3.200000e+01 : f32
    %146 = vector.broadcast %cst_43 : f32 to vector<16x1xf32>
    %147 = arith.divf %145, %146 : vector<16x1xf32>
    %148 = vector.broadcast %140 : vector<16x1xf32> to vector<16x32xf32>
    %149 = arith.subf %136, %148 : vector<16x32xf32>
    %cst_44 = arith.constant 9.99999974E-6 : f32
    %150 = vector.broadcast %cst_44 : f32 to vector<16x1xf32>
    %151 = arith.addf %147, %150 : vector<16x1xf32>
    %152 = math.rsqrt %151 : vector<16x1xf32>
    %153 = vector.broadcast %152 : vector<16x1xf32> to vector<16x32xf32>
    %154 = arith.mulf %149, %153 : vector<16x32xf32>
    %155 = vector.broadcast %37 : vector<1x32xf32> to vector<16x32xf32>
    %156 = arith.mulf %154, %155 : vector<16x32xf32>
    %157 = vector.broadcast %38 : vector<1x32xf32> to vector<16x32xf32>
    %158 = arith.addf %156, %157 : vector<16x32xf32>
    %159 = vector.broadcast %33 : vector<16x1xf32> to vector<16x32xf32>
    %160 = arith.mulf %158, %159 : vector<16x32xf32>
    %161 = arith.truncf %160 : vector<16x32xf32> to vector<16x32xbf16>
    %c0_45 = arith.constant 0 : index
    %c0_46 = arith.constant 0 : index
    %c0_47 = arith.constant 0 : index
    %162 = vector.load %arg7[%c0_45, %c0_46, %c0_47] : memref<2x32x64xbf16, #tpu.memory_space<vmem>>, vector<1x32x64xbf16>
    %163 = vector.shape_cast %162 : vector<1x32x64xbf16> to vector<32x64xbf16>
    %cst_48 = arith.constant dense<0.000000e+00> : vector<16x64xf32>
    %164 = tpu.matmul %161, %163, %cst_48 {dimension_numbers = #tpu.dot_dimension_numbers<[1], [0], [0], [1], [0, 0, 1, 1], [], []>} : vector<16x32xbf16>, vector<32x64xbf16>, vector<16x64xf32> -> vector<16x64xf32>
    %165 = vector.broadcast %39 : vector<1x64xf32> to vector<16x64xf32>
    %166 = arith.addf %164, %165 : vector<16x64xf32>
    %cst_49 = arith.constant 0.000000e+00 : f32
    %167 = vector.broadcast %cst_49 : f32 to vector<16x64xf32>
    %168 = arith.maximumf %166, %167 : vector<16x64xf32>
    %169 = arith.truncf %168 : vector<16x64xf32> to vector<16x64xbf16>
    %c0_50 = arith.constant 0 : index
    %c0_51 = arith.constant 0 : index
    %c0_52 = arith.constant 0 : index
    %170 = vector.load %arg8[%c0_50, %c0_51, %c0_52] : memref<2x64x32xbf16, #tpu.memory_space<vmem>>, vector<1x64x32xbf16>
    %171 = vector.shape_cast %170 : vector<1x64x32xbf16> to vector<64x32xbf16>
    %cst_53 = arith.constant dense<0.000000e+00> : vector<16x32xf32>
    %172 = tpu.matmul %169, %171, %cst_53 {dimension_numbers = #tpu.dot_dimension_numbers<[1], [0], [0], [1], [0, 0, 1, 1], [], []>} : vector<16x64xbf16>, vector<64x32xbf16>, vector<16x32xf32> -> vector<16x32xf32>
    %173 = vector.broadcast %40 : vector<1x32xf32> to vector<16x32xf32>
    %174 = arith.addf %172, %173 : vector<16x32xf32>
    %175 = arith.addf %174, %160 : vector<16x32xf32>
    %cst_54 = arith.constant dense<0.000000e+00> : vector<16xf32>
    %176 = vector.multi_reduction <add>, %175, %cst_54 [1] : vector<16x32xf32> to vector<16xf32>
    %177 = vector.shape_cast %176 : vector<16xf32> to vector<16x1xf32>
    %cst_55 = arith.constant 3.200000e+01 : f32
    %178 = vector.broadcast %cst_55 : f32 to vector<16x1xf32>
    %179 = arith.divf %177, %178 : vector<16x1xf32>
    %180 = vector.broadcast %179 : vector<16x1xf32> to vector<16x32xf32>
    %181 = arith.subf %175, %180 : vector<16x32xf32>
    %182 = arith.mulf %181, %181 : vector<16x32xf32>
    %cst_56 = arith.constant dense<0.000000e+00> : vector<16xf32>
    %183 = vector.multi_reduction <add>, %182, %cst_56 [1] : vector<16x32xf32> to vector<16xf32>
    %184 = vector.shape_cast %183 : vector<16xf32> to vector<16x1xf32>
    %cst_57 = arith.constant 3.200000e+01 : f32
    %185 = vector.broadcast %cst_57 : f32 to vector<16x1xf32>
    %186 = arith.divf %184, %185 : vector<16x1xf32>
    %187 = vector.broadcast %179 : vector<16x1xf32> to vector<16x32xf32>
    %188 = arith.subf %175, %187 : vector<16x32xf32>
    %cst_58 = arith.constant 9.99999974E-6 : f32
    %189 = vector.broadcast %cst_58 : f32 to vector<16x1xf32>
    %190 = arith.addf %186, %189 : vector<16x1xf32>
    %191 = math.rsqrt %190 : vector<16x1xf32>
    %192 = vector.broadcast %191 : vector<16x1xf32> to vector<16x32xf32>
    %193 = arith.mulf %188, %192 : vector<16x32xf32>
    %194 = vector.broadcast %41 : vector<1x32xf32> to vector<16x32xf32>
    %195 = arith.mulf %193, %194 : vector<16x32xf32>
    %196 = vector.broadcast %42 : vector<1x32xf32> to vector<16x32xf32>
    %197 = arith.addf %195, %196 : vector<16x32xf32>
    %198 = vector.broadcast %33 : vector<16x1xf32> to vector<16x32xf32>
    %199 = arith.mulf %197, %198 : vector<16x32xf32>
    %200 = vector.extract_strided_slice %0 {offsets = [11, 0], sizes = [1, 96], strides = [1, 1]} : vector<19x128xf32> to vector<1x96xf32>
    %201 = vector.extract_strided_slice %0 {offsets = [12, 0], sizes = [1, 32], strides = [1, 1]} : vector<19x128xf32> to vector<1x32xf32>
    %202 = vector.extract_strided_slice %0 {offsets = [13, 0], sizes = [1, 32], strides = [1, 1]} : vector<19x128xf32> to vector<1x32xf32>
    %203 = vector.extract_strided_slice %0 {offsets = [14, 0], sizes = [1, 32], strides = [1, 1]} : vector<19x128xf32> to vector<1x32xf32>
    %204 = vector.extract_strided_slice %0 {offsets = [15, 0], sizes = [1, 64], strides = [1, 1]} : vector<19x128xf32> to vector<1x64xf32>
    %205 = vector.extract_strided_slice %0 {offsets = [16, 0], sizes = [1, 32], strides = [1, 1]} : vector<19x128xf32> to vector<1x32xf32>
    %206 = vector.extract_strided_slice %0 {offsets = [17, 0], sizes = [1, 32], strides = [1, 1]} : vector<19x128xf32> to vector<1x32xf32>
    %207 = vector.extract_strided_slice %0 {offsets = [18, 0], sizes = [1, 32], strides = [1, 1]} : vector<19x128xf32> to vector<1x32xf32>
    %208 = arith.truncf %199 : vector<16x32xf32> to vector<16x32xbf16>
    %c1 = arith.constant 1 : index
    %c0_59 = arith.constant 0 : index
    %c0_60 = arith.constant 0 : index
    %209 = vector.load %arg5[%c1, %c0_59, %c0_60] : memref<2x32x96xbf16, #tpu.memory_space<vmem>>, vector<1x32x96xbf16>
    %210 = vector.shape_cast %209 : vector<1x32x96xbf16> to vector<32x96xbf16>
    %cst_61 = arith.constant dense<0.000000e+00> : vector<16x96xf32>
    %211 = tpu.matmul %208, %210, %cst_61 {dimension_numbers = #tpu.dot_dimension_numbers<[1], [0], [0], [1], [0, 0, 1, 1], [], []>} : vector<16x32xbf16>, vector<32x96xbf16>, vector<16x96xf32> -> vector<16x96xf32>
    %212 = vector.broadcast %200 : vector<1x96xf32> to vector<16x96xf32>
    %213 = arith.addf %211, %212 : vector<16x96xf32>
    %214 = vector.extract_strided_slice %213 {offsets = [0, 0], sizes = [16, 8], strides = [1, 1]} : vector<16x96xf32> to vector<16x8xf32>
    %215 = vector.extract_strided_slice %213 {offsets = [0, 32], sizes = [16, 8], strides = [1, 1]} : vector<16x96xf32> to vector<16x8xf32>
    %216 = vector.extract_strided_slice %213 {offsets = [0, 64], sizes = [16, 8], strides = [1, 1]} : vector<16x96xf32> to vector<16x8xf32>
    %217 = arith.truncf %214 : vector<16x8xf32> to vector<16x8xbf16>
    %218 = arith.truncf %215 : vector<16x8xf32> to vector<16x8xbf16>
    %cst_62 = arith.constant dense<0.000000e+00> : vector<16x16xf32>
    %219 = tpu.matmul %217, %218, %cst_62 {dimension_numbers = #tpu.dot_dimension_numbers<[1], [1], [0], [0], [0, 0, 1, 0], [], []>} : vector<16x8xbf16>, vector<16x8xbf16>, vector<16x16xf32> -> vector<16x16xf32>
    %220 = arith.addf %219, %34 : vector<16x16xf32>
    %cst_63 = arith.constant dense<0xFF800000> : vector<16xf32>
    %221 = vector.multi_reduction <maximumf>, %220, %cst_63 [1] : vector<16x16xf32> to vector<16xf32>
    %222 = vector.shape_cast %221 : vector<16xf32> to vector<16x1xf32>
    %223 = vector.broadcast %222 : vector<16x1xf32> to vector<16x16xf32>
    %224 = arith.subf %220, %223 : vector<16x16xf32>
    %225 = math.exp %224 : vector<16x16xf32>
    %cst_64 = arith.constant dense<0.000000e+00> : vector<16xf32>
    %226 = vector.multi_reduction <add>, %225, %cst_64 [1] : vector<16x16xf32> to vector<16xf32>
    %227 = vector.shape_cast %226 : vector<16xf32> to vector<16x1xf32>
    %228 = tpu.reciprocal %227 {approx = true} : vector<16x1xf32> -> vector<16x1xf32>
    %229 = vector.broadcast %228 : vector<16x1xf32> to vector<16x16xf32>
    %230 = arith.mulf %225, %229 : vector<16x16xf32>
    %231 = arith.truncf %230 : vector<16x16xf32> to vector<16x16xbf16>
    %232 = arith.truncf %216 : vector<16x8xf32> to vector<16x8xbf16>
    %cst_65 = arith.constant dense<0.000000e+00> : vector<16x8xf32>
    %233 = tpu.matmul %231, %232, %cst_65 {dimension_numbers = #tpu.dot_dimension_numbers<[1], [0], [0], [1], [0, 0, 1, 1], [], []>} : vector<16x16xbf16>, vector<16x8xbf16>, vector<16x8xf32> -> vector<16x8xf32>
    %234 = vector.extract_strided_slice %213 {offsets = [0, 8], sizes = [16, 8], strides = [1, 1]} : vector<16x96xf32> to vector<16x8xf32>
    %235 = vector.extract_strided_slice %213 {offsets = [0, 40], sizes = [16, 8], strides = [1, 1]} : vector<16x96xf32> to vector<16x8xf32>
    %236 = vector.extract_strided_slice %213 {offsets = [0, 72], sizes = [16, 8], strides = [1, 1]} : vector<16x96xf32> to vector<16x8xf32>
    %237 = arith.truncf %234 : vector<16x8xf32> to vector<16x8xbf16>
    %238 = arith.truncf %235 : vector<16x8xf32> to vector<16x8xbf16>
    %cst_66 = arith.constant dense<0.000000e+00> : vector<16x16xf32>
    %239 = tpu.matmul %237, %238, %cst_66 {dimension_numbers = #tpu.dot_dimension_numbers<[1], [1], [0], [0], [0, 0, 1, 0], [], []>} : vector<16x8xbf16>, vector<16x8xbf16>, vector<16x16xf32> -> vector<16x16xf32>
    %240 = arith.addf %239, %34 : vector<16x16xf32>
    %cst_67 = arith.constant dense<0xFF800000> : vector<16xf32>
    %241 = vector.multi_reduction <maximumf>, %240, %cst_67 [1] : vector<16x16xf32> to vector<16xf32>
    %242 = vector.shape_cast %241 : vector<16xf32> to vector<16x1xf32>
    %243 = vector.broadcast %242 : vector<16x1xf32> to vector<16x16xf32>
    %244 = arith.subf %240, %243 : vector<16x16xf32>
    %245 = math.exp %244 : vector<16x16xf32>
    %cst_68 = arith.constant dense<0.000000e+00> : vector<16xf32>
    %246 = vector.multi_reduction <add>, %245, %cst_68 [1] : vector<16x16xf32> to vector<16xf32>
    %247 = vector.shape_cast %246 : vector<16xf32> to vector<16x1xf32>
    %248 = tpu.reciprocal %247 {approx = true} : vector<16x1xf32> -> vector<16x1xf32>
    %249 = vector.broadcast %248 : vector<16x1xf32> to vector<16x16xf32>
    %250 = arith.mulf %245, %249 : vector<16x16xf32>
    %251 = arith.truncf %250 : vector<16x16xf32> to vector<16x16xbf16>
    %252 = arith.truncf %236 : vector<16x8xf32> to vector<16x8xbf16>
    %cst_69 = arith.constant dense<0.000000e+00> : vector<16x8xf32>
    %253 = tpu.matmul %251, %252, %cst_69 {dimension_numbers = #tpu.dot_dimension_numbers<[1], [0], [0], [1], [0, 0, 1, 1], [], []>} : vector<16x16xbf16>, vector<16x8xbf16>, vector<16x8xf32> -> vector<16x8xf32>
    %254 = vector.extract_strided_slice %213 {offsets = [0, 16], sizes = [16, 8], strides = [1, 1]} : vector<16x96xf32> to vector<16x8xf32>
    %255 = vector.extract_strided_slice %213 {offsets = [0, 48], sizes = [16, 8], strides = [1, 1]} : vector<16x96xf32> to vector<16x8xf32>
    %256 = vector.extract_strided_slice %213 {offsets = [0, 80], sizes = [16, 8], strides = [1, 1]} : vector<16x96xf32> to vector<16x8xf32>
    %257 = arith.truncf %254 : vector<16x8xf32> to vector<16x8xbf16>
    %258 = arith.truncf %255 : vector<16x8xf32> to vector<16x8xbf16>
    %cst_70 = arith.constant dense<0.000000e+00> : vector<16x16xf32>
    %259 = tpu.matmul %257, %258, %cst_70 {dimension_numbers = #tpu.dot_dimension_numbers<[1], [1], [0], [0], [0, 0, 1, 0], [], []>} : vector<16x8xbf16>, vector<16x8xbf16>, vector<16x16xf32> -> vector<16x16xf32>
    %260 = arith.addf %259, %34 : vector<16x16xf32>
    %cst_71 = arith.constant dense<0xFF800000> : vector<16xf32>
    %261 = vector.multi_reduction <maximumf>, %260, %cst_71 [1] : vector<16x16xf32> to vector<16xf32>
    %262 = vector.shape_cast %261 : vector<16xf32> to vector<16x1xf32>
    %263 = vector.broadcast %262 : vector<16x1xf32> to vector<16x16xf32>
    %264 = arith.subf %260, %263 : vector<16x16xf32>
    %265 = math.exp %264 : vector<16x16xf32>
    %cst_72 = arith.constant dense<0.000000e+00> : vector<16xf32>
    %266 = vector.multi_reduction <add>, %265, %cst_72 [1] : vector<16x16xf32> to vector<16xf32>
    %267 = vector.shape_cast %266 : vector<16xf32> to vector<16x1xf32>
    %268 = tpu.reciprocal %267 {approx = true} : vector<16x1xf32> -> vector<16x1xf32>
    %269 = vector.broadcast %268 : vector<16x1xf32> to vector<16x16xf32>
    %270 = arith.mulf %265, %269 : vector<16x16xf32>
    %271 = arith.truncf %270 : vector<16x16xf32> to vector<16x16xbf16>
    %272 = arith.truncf %256 : vector<16x8xf32> to vector<16x8xbf16>
    %cst_73 = arith.constant dense<0.000000e+00> : vector<16x8xf32>
    %273 = tpu.matmul %271, %272, %cst_73 {dimension_numbers = #tpu.dot_dimension_numbers<[1], [0], [0], [1], [0, 0, 1, 1], [], []>} : vector<16x16xbf16>, vector<16x8xbf16>, vector<16x8xf32> -> vector<16x8xf32>
    %274 = vector.extract_strided_slice %213 {offsets = [0, 24], sizes = [16, 8], strides = [1, 1]} : vector<16x96xf32> to vector<16x8xf32>
    %275 = vector.extract_strided_slice %213 {offsets = [0, 56], sizes = [16, 8], strides = [1, 1]} : vector<16x96xf32> to vector<16x8xf32>
    %276 = vector.extract_strided_slice %213 {offsets = [0, 88], sizes = [16, 8], strides = [1, 1]} : vector<16x96xf32> to vector<16x8xf32>
    %277 = arith.truncf %274 : vector<16x8xf32> to vector<16x8xbf16>
    %278 = arith.truncf %275 : vector<16x8xf32> to vector<16x8xbf16>
    %cst_74 = arith.constant dense<0.000000e+00> : vector<16x16xf32>
    %279 = tpu.matmul %277, %278, %cst_74 {dimension_numbers = #tpu.dot_dimension_numbers<[1], [1], [0], [0], [0, 0, 1, 0], [], []>} : vector<16x8xbf16>, vector<16x8xbf16>, vector<16x16xf32> -> vector<16x16xf32>
    %280 = arith.addf %279, %34 : vector<16x16xf32>
    %cst_75 = arith.constant dense<0xFF800000> : vector<16xf32>
    %281 = vector.multi_reduction <maximumf>, %280, %cst_75 [1] : vector<16x16xf32> to vector<16xf32>
    %282 = vector.shape_cast %281 : vector<16xf32> to vector<16x1xf32>
    %283 = vector.broadcast %282 : vector<16x1xf32> to vector<16x16xf32>
    %284 = arith.subf %280, %283 : vector<16x16xf32>
    %285 = math.exp %284 : vector<16x16xf32>
    %cst_76 = arith.constant dense<0.000000e+00> : vector<16xf32>
    %286 = vector.multi_reduction <add>, %285, %cst_76 [1] : vector<16x16xf32> to vector<16xf32>
    %287 = vector.shape_cast %286 : vector<16xf32> to vector<16x1xf32>
    %288 = tpu.reciprocal %287 {approx = true} : vector<16x1xf32> -> vector<16x1xf32>
    %289 = vector.broadcast %288 : vector<16x1xf32> to vector<16x16xf32>
    %290 = arith.mulf %285, %289 : vector<16x16xf32>
    %291 = arith.truncf %290 : vector<16x16xf32> to vector<16x16xbf16>
    %292 = arith.truncf %276 : vector<16x8xf32> to vector<16x8xbf16>
    %cst_77 = arith.constant dense<0.000000e+00> : vector<16x8xf32>
    %293 = tpu.matmul %291, %292, %cst_77 {dimension_numbers = #tpu.dot_dimension_numbers<[1], [0], [0], [1], [0, 0, 1, 1], [], []>} : vector<16x16xbf16>, vector<16x8xbf16>, vector<16x8xf32> -> vector<16x8xf32>
    %294 = tpu.concatenate %233, %253, %273, %293 in 1 : vector<16x8xf32>, vector<16x8xf32>, vector<16x8xf32>, vector<16x8xf32> -> vector<16x32xf32>
    %295 = arith.truncf %294 : vector<16x32xf32> to vector<16x32xbf16>
    %c1_78 = arith.constant 1 : index
    %c0_79 = arith.constant 0 : index
    %c0_80 = arith.constant 0 : index
    %296 = vector.load %arg6[%c1_78, %c0_79, %c0_80] : memref<2x32x32xbf16, #tpu.memory_space<vmem>>, vector<1x32x32xbf16>
    %297 = vector.shape_cast %296 : vector<1x32x32xbf16> to vector<32x32xbf16>
    %cst_81 = arith.constant dense<0.000000e+00> : vector<16x32xf32>
    %298 = tpu.matmul %295, %297, %cst_81 {dimension_numbers = #tpu.dot_dimension_numbers<[1], [0], [0], [1], [0, 0, 1, 1], [], []>} : vector<16x32xbf16>, vector<32x32xbf16>, vector<16x32xf32> -> vector<16x32xf32>
    %299 = vector.broadcast %201 : vector<1x32xf32> to vector<16x32xf32>
    %300 = arith.addf %298, %299 : vector<16x32xf32>
    %301 = arith.addf %300, %199 : vector<16x32xf32>
    %cst_82 = arith.constant dense<0.000000e+00> : vector<16xf32>
    %302 = vector.multi_reduction <add>, %301, %cst_82 [1] : vector<16x32xf32> to vector<16xf32>
    %303 = vector.shape_cast %302 : vector<16xf32> to vector<16x1xf32>
    %cst_83 = arith.constant 3.200000e+01 : f32
    %304 = vector.broadcast %cst_83 : f32 to vector<16x1xf32>
    %305 = arith.divf %303, %304 : vector<16x1xf32>
    %306 = vector.broadcast %305 : vector<16x1xf32> to vector<16x32xf32>
    %307 = arith.subf %301, %306 : vector<16x32xf32>
    %308 = arith.mulf %307, %307 : vector<16x32xf32>
    %cst_84 = arith.constant dense<0.000000e+00> : vector<16xf32>
    %309 = vector.multi_reduction <add>, %308, %cst_84 [1] : vector<16x32xf32> to vector<16xf32>
    %310 = vector.shape_cast %309 : vector<16xf32> to vector<16x1xf32>
    %cst_85 = arith.constant 3.200000e+01 : f32
    %311 = vector.broadcast %cst_85 : f32 to vector<16x1xf32>
    %312 = arith.divf %310, %311 : vector<16x1xf32>
    %313 = vector.broadcast %305 : vector<16x1xf32> to vector<16x32xf32>
    %314 = arith.subf %301, %313 : vector<16x32xf32>
    %cst_86 = arith.constant 9.99999974E-6 : f32
    %315 = vector.broadcast %cst_86 : f32 to vector<16x1xf32>
    %316 = arith.addf %312, %315 : vector<16x1xf32>
    %317 = math.rsqrt %316 : vector<16x1xf32>
    %318 = vector.broadcast %317 : vector<16x1xf32> to vector<16x32xf32>
    %319 = arith.mulf %314, %318 : vector<16x32xf32>
    %320 = vector.broadcast %202 : vector<1x32xf32> to vector<16x32xf32>
    %321 = arith.mulf %319, %320 : vector<16x32xf32>
    %322 = vector.broadcast %203 : vector<1x32xf32> to vector<16x32xf32>
    %323 = arith.addf %321, %322 : vector<16x32xf32>
    %324 = vector.broadcast %33 : vector<16x1xf32> to vector<16x32xf32>
    %325 = arith.mulf %323, %324 : vector<16x32xf32>
    %326 = arith.truncf %325 : vector<16x32xf32> to vector<16x32xbf16>
    %c1_87 = arith.constant 1 : index
    %c0_88 = arith.constant 0 : index
    %c0_89 = arith.constant 0 : index
    %327 = vector.load %arg7[%c1_87, %c0_88, %c0_89] : memref<2x32x64xbf16, #tpu.memory_space<vmem>>, vector<1x32x64xbf16>
    %328 = vector.shape_cast %327 : vector<1x32x64xbf16> to vector<32x64xbf16>
    %cst_90 = arith.constant dense<0.000000e+00> : vector<16x64xf32>
    %329 = tpu.matmul %326, %328, %cst_90 {dimension_numbers = #tpu.dot_dimension_numbers<[1], [0], [0], [1], [0, 0, 1, 1], [], []>} : vector<16x32xbf16>, vector<32x64xbf16>, vector<16x64xf32> -> vector<16x64xf32>
    %330 = vector.broadcast %204 : vector<1x64xf32> to vector<16x64xf32>
    %331 = arith.addf %329, %330 : vector<16x64xf32>
    %cst_91 = arith.constant 0.000000e+00 : f32
    %332 = vector.broadcast %cst_91 : f32 to vector<16x64xf32>
    %333 = arith.maximumf %331, %332 : vector<16x64xf32>
    %334 = arith.truncf %333 : vector<16x64xf32> to vector<16x64xbf16>
    %c1_92 = arith.constant 1 : index
    %c0_93 = arith.constant 0 : index
    %c0_94 = arith.constant 0 : index
    %335 = vector.load %arg8[%c1_92, %c0_93, %c0_94] : memref<2x64x32xbf16, #tpu.memory_space<vmem>>, vector<1x64x32xbf16>
    %336 = vector.shape_cast %335 : vector<1x64x32xbf16> to vector<64x32xbf16>
    %cst_95 = arith.constant dense<0.000000e+00> : vector<16x32xf32>
    %337 = tpu.matmul %334, %336, %cst_95 {dimension_numbers = #tpu.dot_dimension_numbers<[1], [0], [0], [1], [0, 0, 1, 1], [], []>} : vector<16x64xbf16>, vector<64x32xbf16>, vector<16x32xf32> -> vector<16x32xf32>
    %338 = vector.broadcast %205 : vector<1x32xf32> to vector<16x32xf32>
    %339 = arith.addf %337, %338 : vector<16x32xf32>
    %340 = arith.addf %339, %325 : vector<16x32xf32>
    %cst_96 = arith.constant dense<0.000000e+00> : vector<16xf32>
    %341 = vector.multi_reduction <add>, %340, %cst_96 [1] : vector<16x32xf32> to vector<16xf32>
    %342 = vector.shape_cast %341 : vector<16xf32> to vector<16x1xf32>
    %cst_97 = arith.constant 3.200000e+01 : f32
    %343 = vector.broadcast %cst_97 : f32 to vector<16x1xf32>
    %344 = arith.divf %342, %343 : vector<16x1xf32>
    %345 = vector.broadcast %344 : vector<16x1xf32> to vector<16x32xf32>
    %346 = arith.subf %340, %345 : vector<16x32xf32>
    %347 = arith.mulf %346, %346 : vector<16x32xf32>
    %cst_98 = arith.constant dense<0.000000e+00> : vector<16xf32>
    %348 = vector.multi_reduction <add>, %347, %cst_98 [1] : vector<16x32xf32> to vector<16xf32>
    %349 = vector.shape_cast %348 : vector<16xf32> to vector<16x1xf32>
    %cst_99 = arith.constant 3.200000e+01 : f32
    %350 = vector.broadcast %cst_99 : f32 to vector<16x1xf32>
    %351 = arith.divf %349, %350 : vector<16x1xf32>
    %352 = vector.broadcast %344 : vector<16x1xf32> to vector<16x32xf32>
    %353 = arith.subf %340, %352 : vector<16x32xf32>
    %cst_100 = arith.constant 9.99999974E-6 : f32
    %354 = vector.broadcast %cst_100 : f32 to vector<16x1xf32>
    %355 = arith.addf %351, %354 : vector<16x1xf32>
    %356 = math.rsqrt %355 : vector<16x1xf32>
    %357 = vector.broadcast %356 : vector<16x1xf32> to vector<16x32xf32>
    %358 = arith.mulf %353, %357 : vector<16x32xf32>
    %359 = vector.broadcast %206 : vector<1x32xf32> to vector<16x32xf32>
    %360 = arith.mulf %358, %359 : vector<16x32xf32>
    %361 = vector.broadcast %207 : vector<1x32xf32> to vector<16x32xf32>
    %362 = arith.addf %360, %361 : vector<16x32xf32>
    %363 = vector.broadcast %33 : vector<16x1xf32> to vector<16x32xf32>
    %364 = arith.mulf %362, %363 : vector<16x32xf32>
    %c0_101 = arith.constant 0 : index
    %c0_102 = arith.constant 0 : index
    %365 = vector.load %arg10[%c0_101, %c0_102] : memref<16x32xf32, #tpu.memory_space<vmem>>, vector<16x32xf32>
    tpu.vector_store %arg10[%c0_101, %c0_102], %364 {strides = array<i32>} : memref<16x32xf32, #tpu.memory_space<vmem>>, vector<16x32xf32>,
    return
  }
}

</mosaic_0001>

<bundles_post_ra>
// kernel: eq.8
= control target key start
LH: loop header
LB: loop body
LE: loop exit
PB: predicated region body
PF: predicated region fallthrough
CT: control target
= control target key end

     0   :  { %vm7_vm0 = vcmask 64512   ;;  %vm13_vm1 = vcmask 130112   ;;  %s39_s0 = inlined_call_operand.vmem [shape: s32[2,8], index: 0, kind: input, shape index: {}]   ;;  %s40_s1 = inlined_call_operand.vmem [shape: s32[16], index: 1, kind: output, shape index: {}]  }
   0x1   :  { %v4_v0 = vld [vmem:[%s39_s0] sm:$0x3]  ;;  %s22_s0 = smov 8  }
   0x2   :  { %5 = vst [vmem:[#allocation1] sm:$0x3] %v4_v0 }
   0x9   :  { %v10_v1 = vld [vmem:[#allocation1 + $0x1] sm:$0x1]   ;;  %v6_v2 = vld [vmem:[#allocation1] sm:$0x1]  }
   0xa   :  { %11 = vrot.lane.b32.xlu0 %v10_v1, %s22_s0  ;;  %8 = vst.msk [vmem:[#allocation0] sm:$0x1] %vm7_vm0, %v6_v2  }
  0x7c   :  { %v12_v3 = vpop.permute.xlu0 %11  }
  0x7d   :  { %14 = vst.msk [vmem:[#allocation0] sm:$0x1] %vm13_vm1, %v12_v3  }
  0x84   :  { %v18_v4 = vld [vmem:[#allocation0] sm:$0x1] }
  0x85   :  { %20 = vst [vmem:[%s40_s1] sm:$0x1] %v18_v4 }

// kernel: video_encoder_forward.1
= control target key start
LH: loop header
LB: loop body
LE: loop exit
PB: predicated region body
PF: predicated region fallthrough
CT: control target
= control target key end

     0   :  { %s3764_s0 = inlined_call_operand.vmem [shape: bf16[16,768], index: 0, kind: input, shape index: {}]   ;;  %s3765_s1 = inlined_call_operand.vmem [shape: bf16[768,32], index: 1, kind: input, shape index: {}]   ;;  %s3766_s2 = inlined_call_operand.vmem [shape: f32[16,32], index: 2, kind: input, shape index: {}]   ;;  %s3767_s3 = inlined_call_operand.vmem [shape: f32[16,1], index: 3, kind: input, shape index: {}]   ;;  %s3768_s4 = inlined_call_operand.vmem [shape: f32[16,16], index: 4, kind: input, shape index: {}]   ;;  %s3769_s5 = inlined_call_operand.vmem [shape: bf16[2,32,96], index: 5, kind: input, shape index: {}]   ;;  %s3770_s6 = inlined_call_operand.vmem [shape: bf16[2,32,32], index: 6, kind: input, shape index: {}]   ;;  %s3771_s7 = inlined_call_operand.vmem [shape: bf16[2,32,64], index: 7, kind: input, shape index: {}]   ;;  %s3772_s8 = inlined_call_operand.vmem [shape: bf16[2,64,32], index: 8, kind: input, shape index: {}]   ;;  %s3773_s9 = inlined_call_operand.vmem [shape: f32[19,128], index: 9, kind: input, shape index: {}]   ;;  %s3774_s10 = inlined_call_operand.hbm [shape: f32[16,32], index: 10, kind: output, shape index: {}]  }
   0x1   :  { %v2886_v0 = vld [vmem:[%s3765_s1 + $0x40] sm:$0xff]   ;;  %v2890_v4 = vld [vmem:[%s3765_s1 + $0x48] sm:$0xff]   ;;  %v2894_v8 = vld [vmem:[%s3765_s1 + $0x50] sm:$0xff]  }
   0x2   :  { %v2887_v1 = vld [vmem:[%s3765_s1] sm:$0xff]   ;;  %2541 = vmatprep.subr.bf16.mxu0 %v2886_v0  ;;  %v2891_v5 = vld [vmem:[%s3765_s1 + $0x8] sm:$0xff]   ;;  %v2895_v9 = vld [vmem:[%s3765_s1 + $0x10] sm:$0xff]  }
   0x3   :  { %v2888_v2 = vld [vmem:[%s3765_s1 + $0xc0] sm:$0xff]   ;;  %2542 = vmatpush3.bf16.msra.mxu0 %v2887_v1  ;;  %v2892_v6 = vld [vmem:[%s3765_s1 + $0xc8] sm:$0xff]   ;;  %v2896_v10 = vld [vmem:[%s3765_s1 + $0xd0] sm:$0xff]  }
   0x4   :  { %v2889_v3 = vld [vmem:[%s3765_s1 + $0x80] sm:$0xff]   ;;  %2563 = vmatprep.subr.bf16.mxu1 %v2888_v2  ;;  %2543 = vmatprep.subr.bf16.mxu0 %v2890_v4  ;;  %v2893_v7 = vld [vmem:[%s3765_s1 + $0x88] sm:$0xff]   ;;  %v2897_v11 = vld [vmem:[%s3765_s1 + $0x90] sm:$0xff]  }
   0x5   :  { %2564 = vmatpush3.bf16.msra.mxu1 %v2889_v3  ;;  %v2898_v12 = vld [vmem:[%s3765_s1 + $0x58] sm:$0xff]   ;;  %v2902_v16 = vld [vmem:[%s3765_s1 + $0x60] sm:$0xff]   ;;  %v2906_v20 = vld [vmem:[%s3765_s1 + $0x68] sm:$0xff]  }
   0x6   :  { %2565 = vmatprep.subr.bf16.mxu1 %v2892_v6  ;;  %v2899_v13 = vld [vmem:[%s3765_s1 + $0x18] sm:$0xff]   ;;  %v2903_v17 = vld [vmem:[%s3765_s1 + $0x20] sm:$0xff]   ;;  %v2907_v21 = vld [vmem:[%s3765_s1 + $0x28] sm:$0xff]  }
   0x7   :  { %2544 = vmatpush3.bf16.msra.mxu0 %v2891_v5  ;;  %v2900_v14 = vld [vmem:[%s3765_s1 + $0xd8] sm:$0xff]   ;;  %v2904_v18 = vld [vmem:[%s3765_s1 + $0xe0] sm:$0xff]   ;;  %v2908_v22 = vld [vmem:[%s3765_s1 + $0xe8] sm:$0xff]  }
   0x8   :  { %2545 = vmatprep.subr.bf16.mxu0 %v2894_v8  ;;  %v2901_v15 = vld [vmem:[%s3765_s1 + $0x98] sm:$0xff]   ;;  %v2905_v19 = vld [vmem:[%s3765_s1 + $0xa0] sm:$0xff]   ;;  %v2909_v23 = vld [vmem:[%s3765_s1 + $0xa8] sm:$0xff]  }
   0x9   :  { %2566 = vmatpush3.bf16.msra.mxu1 %v2893_v7  ;;  %v2910_v24 = vld [vmem:[%s3765_s1 + $0x70] sm:$0xff]   ;;  %v2914_v28 = vld [vmem:[%s3765_s1 + $0x78] sm:$0xff]   ;;  %v2921_v34 = vld [vmem:[%s3765_s1 + $0x140] sm:$0xff]  }
   0xa   :  { %2567 = vmatprep.subr.bf16.mxu1 %v2896_v10  ;;  %v2911_v25 = vld [vmem:[%s3765_s1 + $0x30] sm:$0xff]   ;;  %v2915_v29 = vld [vmem:[%s3765_s1 + $0x38] sm:$0xff]   ;;  %v2922_v35 = vld [vmem:[%s3764_s0 + $0x8] ss:$24 sps:$4 sm:$0xff]  }
   0xb   :  { %2546 = vmatpush3.bf16.msra.mxu0 %v2895_v9  ;;  %v2912_v26 = vld [vmem:[%s3765_s1 + $0xf0] sm:$0xff]   ;;  %v2916_v30 = vld [vmem:[%s3765_s1 + $0xf8] sm:$0xff]   ;;  %v2924_v36 = vld [vmem:[%s3764_s0 + $0xc] ss:$24 sps:$4 sm:$0xff]  }
   0xc   :  { %2547 = vmatprep.subr.bf16.mxu0 %v2898_v12  ;;  %v2913_v27 = vld [vmem:[%s3765_s1 + $0xb0] sm:$0xff]   ;;  %v2917_v31 = vld [vmem:[%s3764_s0] ss:$24 sps:$4 sm:$0xff]   ;;  %v2919_v32 = vld [vmem:[%s3764_s0 + $0x4] ss:$24 sps:$4 sm:$0xff]   ;;  %537 = vmatprep.mubr.bf16.mxu1 %v2924_v36 }
   0xd   :  { %2568 = vmatpush3.bf16.msra.mxu1 %v2897_v11  ;;  %v2920_v33 = vld [vmem:[%s3765_s1 + $0xb8] sm:$0xff]   ;;  %496 = vmatprep.mubr.bf16.mxu0 %v2919_v32  ;;  %v2925_v37 = vld [vmem:[%s3765_s1 + $0x100] sm:$0xff]   ;;  %v2926_v38 = vld [vmem:[%s3765_s1 + $0x148] sm:$0xff]  }
   0xe   :  { %2569 = vmatprep.subr.bf16.mxu1 %v2900_v14  ;;  %v2927_v39 = vld [vmem:[%s3765_s1 + $0x108] sm:$0xff]   ;;  %v2928_v40 = vld [vmem:[%s3765_s1 + $0x150] sm:$0xff]   ;;  %v2930_v42 = vld [vmem:[%s3765_s1 + $0x158] sm:$0xff]  }
   0xf   :  { %2548 = vmatpush3.bf16.msra.mxu0 %v2899_v13  ;;  %v2929_v41 = vld [vmem:[%s3765_s1 + $0x110] sm:$0xff]   ;;  %v2931_v43 = vld [vmem:[%s3765_s1 + $0x118] sm:$0xff]   ;;  %v2932_v44 = vld [vmem:[%s3765_s1 + $0x160] sm:$0xff]  }
  0x10   :  { %2549 = vmatprep.subr.bf16.mxu0 %v2902_v16  ;;  %v2933_v45 = vld [vmem:[%s3765_s1 + $0x120] sm:$0xff]   ;;  %v2934_v46 = vld [vmem:[%s3765_s1 + $0x168] sm:$0xff]   ;;  %v2936_v49 = vld [vmem:[%s3765_s1 + $0x170] sm:$0xff]  }
  0x11   :  { %2570 = vmatpush3.bf16.msra.mxu1 %v2901_v15  ;;  %v2942_v47 = vld [vmem:[%s3764_s0 + $0x14] ss:$24 sps:$4 sm:$0xff]   ;;  %v2938_v51 = vld [vmem:[%s3765_s1 + $0x178] sm:$0xff]   ;;  %v2940_v53 = vld [vmem:[%s3764_s0 + $0x10] ss:$24 sps:$4 sm:$0xff]  }
  0x12   :  { %2571 = vmatprep.subr.bf16.mxu1 %v2904_v18  ;;  %v2935_v48 = vld [vmem:[%s3765_s1 + $0x128] sm:$0xff]   ;;  %v2937_v50 = vld [vmem:[%s3765_s1 + $0x130] sm:$0xff]   ;;  %v2939_v52 = vld [vmem:[%s3765_s1 + $0x138] sm:$0xff]  }
  0x13   :  { %2550 = vmatpush3.bf16.msra.mxu0 %v2903_v17 }
  0x14   :  { %2551 = vmatprep.subr.bf16.mxu0 %v2906_v20 }
  0x15   :  { %2572 = vmatpush3.bf16.msra.mxu1 %v2905_v19 }
  0x16   :  { %2573 = vmatprep.subr.bf16.mxu1 %v2908_v22 }
  0x17   :  { %2552 = vmatpush3.bf16.msra.mxu0 %v2907_v21 }
  0x18   :  { %2553 = vmatprep.subr.bf16.mxu0 %v2910_v24 }
  0x19   :  { %2574 = vmatpush3.bf16.msra.mxu1 %v2909_v23 }
  0x1a   :  { %2575 = vmatprep.subr.bf16.mxu1 %v2912_v26 }
  0x1b   :  { %2554 = vmatpush3.bf16.msra.mxu0 %v2911_v25 }
  0x1c   :  { %2555 = vmatprep.subr.bf16.mxu0 %v2914_v28 }
  0x1d   :  { %2576 = vmatpush3.bf16.msra.mxu1 %v2913_v27 }
  0x1e   :  { %2577 = vmatprep.subr.bf16.mxu1 %v2916_v30 }
  0x1f   :  { %2556 = vmatpush3.bf16.msra.mxu0 %v2915_v29 }
  0x20   :  { %2585 = vmatprep.subr.bf16.mxu0 %v2921_v34 }
  0x21   :  { %2578 = vmatpush3.bf16.msra.mxu1 %v2920_v33 }
  0x22   :  { %497 = vmatmul.mubr.bf16.vlgmr.msra.gmra.mrb[0].mxu0 %v2917_v31 }
  0x23   :  { %2586 = vmatpush3.bf16.msra.mxu0 %v2925_v37  ;;  %578 = vmatprep.mubr.bf16.mxu0 %v2942_v47 }
  0x24   :  { %538 = vmatmul.mubr.bf16.vlgmr.msra.gmra.mrb[0].mxu1 %v2922_v35  ;;  %2587 = vmatprep.subr.bf16.mxu0 %v2926_v38 }
  0x27   :  { %2588 = vmatpush3.bf16.msra.mxu0 %v2927_v39 }
  0x28   :  { %2589 = vmatprep.subr.bf16.mxu0 %v2928_v40 }
  0x2b   :  { %2590 = vmatpush3.bf16.msra.mxu0 %v2929_v41 }
  0x2c   :  { %2591 = vmatprep.subr.bf16.mxu0 %v2930_v42 }
  0x2f   :  { %2592 = vmatpush3.bf16.msra.mxu0 %v2931_v43 }
  0x30   :  { %2593 = vmatprep.subr.bf16.mxu0 %v2932_v44 }
  0x33   :  { %2594 = vmatpush3.bf16.msra.mxu0 %v2933_v45 }
  0x34   :  { %2595 = vmatprep.subr.bf16.mxu0 %v2934_v46 }
  0x37   :  { %2596 = vmatpush3.bf16.msra.mxu0 %v2935_v48 }
  0x38   :  { %2597 = vmatprep.subr.bf16.mxu0 %v2936_v49 }
  0x3b   :  { %2598 = vmatpush3.bf16.msra.mxu0 %v2937_v50 }
  0x3c   :  { %2599 = vmatprep.subr.bf16.mxu0 %v2938_v51 }
  0x3d   :  { %15 = vsyncpa [#allocation3], 0  ;;  %v142_v54 = vlaneseq  ;;  %v3315_v57 = vld [vmem:[%s3773_s9] sm:$0xff]  ;;  %vm587_vm0 = vcmask 261120   ;;  %v3071_v32 = vmov 0.0   ;;  %v2944_v33 = vld [vmem:[%s3769_s5 + $0x8] sm:$0xff]  }
  0x3e   :  { %v2943_v31 = vld [vmem:[%s3769_s5] sm:$0xff]   ;;  %2667 = vmatprep.subr.bf16.mxu1 %v3071_v32  ;;  %vm3072_vm1 = vmmov 0   ;;  %s3074_s29 = smov 88   ;;  %s3075_s30 = smov 120   ;;  %vm704_vm2 = vcmask 64512   ;;  %vm752_vm3 = vcmask 130048  }
  0x3f   :  { %2600 = vmatpush3.bf16.msra.mxu0 %v2939_v52  ;;  %v3307_v55 = vshrl.u32 %v142_v54, 7  ;;  %2668 = vmatpush3.bf16.msra.mxu1 %v2943_v31  ;;  %v627_v51 = vld [vmem:[%s3766_s2] sm:$0xff]  ;;  %v628_v52 = vld [vmem:[%s3766_s2 + $0x8] sm:$0xff]  ;;  %s3073_s2 = smov 96   ;;  %s3077_s15 = smov 80   ;;  %vm1214_vm4 = vcmask 195584  }
  0x40   :  { %2705 = vmatprep.subr.bf16.mxu0 %v3071_v32  ;;  %2671 = vmatprep.mubr.msk.bf16.mxu1 %vm3072_vm1, %v3071_v32  ;;  %s3078_s16 = smov 112   ;;  %s3079_s17 = smov 72   ;;  %vm1438_vm5 = vcmask 523264  }
  0x41   :  { %v3310_v56 = vsub.s32 0, %v3307_v55  ;;  %2669 = vmatprep.subr.bf16.mxu1 %v3071_v32  ;;  %v3338_v40 = vsub.s32 1, %v3307_v55  ;;  %v3343_v42 = vsub.s32 2, %v3307_v55  ;;  %s3080_s18 = smov 56   ;;  %s3081_s19 = smov 104  }
  0x42   :  { %579 = vmatmul.mubr.bf16.vlgmr.msra.gmra.mrb[4].mxu0 %v2940_v53  ;;  %s3082_s20 = smov 48   ;;  %s3083_s21 = smov 8  }
  0x43   :  { %v145_v59 = vrot.slane %v3315_v57, %v3310_v56  ;;  %2707 = vmatprep.mubr.msk.bf16.mxu0 %vm3072_vm1, %v3071_v32  ;;  %2670 = vmatpush3.bf16.msra.mxu1 %v2944_v33  ;;  %v618_v41 = vrot.slane %v3315_v57, %v3338_v40  ;;  %v624_v46 = vrot.slane %v3315_v57, %v3343_v42  ;;  %s3084_s22 = smov 40   ;;  %s3085_s25 = smov 16  }
  0x44   :  { %2675 = vmatprep.subr.bf16.mxu1 %v3071_v32  ;;  %s3086_s26 = smov 24  }
  0xf5   :  { %v2557_v58 = vpop.f32.mrb[0].mxu0 }
  0xf6   :  { %v2558_v60 = vpop.f32.mrb[1].mxu0 }
  0xf7   :  { %v2559_v61 = vadd.f32 %v2558_v60, %v2557_v58  ;;  %v2560_v62 = vpop.f32.mrb[2].mxu0  ;;  %v2579_v63 = vpop.f32.mrb[0].mxu1  ;;  %v642_v60 = vsub.s32 3, %v3307_v55 }
  0xf8   :  { %v2561_v0 = vpop.f32.mrb[3].mxu0  ;;  %v2580_v3 = vpop.f32.mrb[1].mxu1 }
  0xf9   :  { %v499_v1 = vadd.f32 %v2559_v61, %v145_v59  ;;  %v2562_v2 = vadd.f32 %v2561_v0, %v2560_v62  ;;  %v2581_v4 = vadd.f32 %v2580_v3, %v2579_v63  ;;  %v2582_v5 = vpop.f32.mrb[2].mxu1  ;;  %v643_v61 = vrot.slane %v3315_v57, %v642_v60 }
  0xfa   :  { %v2583_v7 = vpop.f32.mrb[3].mxu1 }
  0xfb   :  { %v502_v6 = vadd.f32 %v2562_v2, %v145_v59  ;;  %v540_v8 = vadd.f32 %v2581_v4, %v499_v1  ;;  %v2584_v9 = vadd.f32 %v2583_v7, %v2582_v5  ;;  %v3383_v7 = vld [vmem:[%s3768_s4] sm:$0xff] }
  0xfd   :  { %v543_v10 = vadd.f32 %v2584_v9, %v502_v6  ;;  %v3388_v9 = vld [vmem:[%s3768_s4 + $0x8] sm:$0xff]  ;;  %s3076_s4 = smov 64  }
 0x115   :  { %v2601_v11 = vpop.f32.mrb[4].mxu0 }
 0x116   :  { %v2602_v12 = vpop.f32.mrb[5].mxu0 }
 0x117   :  { %v2603_v13 = vadd.f32 %v2602_v12, %v2601_v11  ;;  %v2604_v14 = vpop.f32.mrb[6].mxu0 }
 0x118   :  { %v2605_v15 = vpop.f32.mrb[7].mxu0 }
 0x119   :  { %v2606_v16 = vadd.f32 %v2605_v15, %v2604_v14  ;;  %v581_v17 = vadd.f32 %v2603_v13, %v540_v8 }
 0x11b   :  { %v588_v18 = vsel %vm587_vm0, %v581_v17, 0.0  ;;  %v584_v19 = vadd.f32 %v2606_v16, %v543_v10 }
 0x11c   :  { %589 = vadd.xlane.f32.xlu0 %v588_v18 }
 0x11d   :  { %v591_v20 = vsel %vm587_vm0, %v584_v19, 0.0 }
 0x120   :  { %592 = vadd.xlane.f32.xlu0 %v591_v20 }
 0x1a9   :  { %v590_v21 = vpop.xlane.xlu0 %589 }
 0x1aa   :  { %v595_v22 = vmul.f32 0.03125, %v590_v21 }
 0x1ac   :  { %v597_v23 = vsub.f32 %v581_v17, %v595_v22 }
 0x1ad   :  { %v593_v24 = vpop.xlane.xlu0 %592 }
 0x1ae   :  { %v596_v25 = vmul.f32 0.03125, %v593_v24  ;;  %v599_v26 = vmul.f32 %v597_v23, %v597_v23 }
 0x1b0   :  { %v598_v27 = vsub.f32 %v584_v19, %v596_v25  ;;  %v601_v28 = vsel %vm587_vm0, %v599_v26, 0.0 }
 0x1b1   :  { %602 = vadd.xlane.f32.xlu1 %v601_v28 }
 0x1b2   :  { %v600_v29 = vmul.f32 %v598_v27, %v598_v27 }
 0x1b4   :  { %v604_v30 = vsel %vm587_vm0, %v600_v29, 0.0 }
 0x1b5   :  { %605 = vadd.xlane.f32.xlu1 %v604_v30 }
 0x23e   :  { %v603_v34 = vpop.xlane.xlu1 %602 }
 0x23f   :  { %v607_v35 = vmul.f32 0.03125, %v603_v34 }
 0x241   :  { %v609_v36 = vadd.f32 1e-05, %v607_v35 }
 0x242   :  { %v606_v37 = vpop.xlane.xlu1 %605 }
 0x243   :  { %2963 = vrsqrt.f32 %v609_v36  ;;  %v608_v38 = vmul.f32 0.03125, %v606_v37 }
 0x245   :  { %v610_v39 = vadd.f32 1e-05, %v608_v38 }
 0x247   :  { %2965 = vrsqrt.f32 %v610_v39 }
 0x24d   :  { %v2964_v43 = vpop.eup %2963 }
 0x24e   :  { %v613_v44 = vmul.f32 %v2964_v43, %v597_v23 }
 0x250   :  { %v619_v45 = vmul.f32 %v618_v41, %v613_v44 }
 0x251   :  { %v2966_v47 = vpop.eup %2965 }
 0x252   :  { %v614_v48 = vmul.f32 %v2966_v47, %v598_v27  ;;  %v625_v50 = vadd.f32 %v624_v46, %v619_v45 }
 0x254   :  { %v620_v49 = vmul.f32 %v618_v41, %v614_v48  ;;  %v3353_v54 = vadd.f32 %v627_v51, %v625_v50 }
 0x256   :  { %v626_v53 = vadd.f32 %v624_v46, %v620_v49 }
 0x258   :  { %v3355_v58 = vadd.f32 %v628_v52, %v626_v53 }
 0x25a   :  { %v635_v59 = vpack.c.bf16 %v3355_v58, %v3353_v54 }
 0x25c   :  { %2672 = vmatmul.mubr.msk.bf16.vlgmr.msra.gmra.mrb[4].mxu1 %vm587_vm0, %v635_v59 }
 0x25d   :  { %2677 = vmatprep.mubr.msk.bf16.mxu1 %vm3072_vm1, %v3071_v32 }
 0x32f   :  { %v693_v62 = vpop.f32.mrb[4].mxu1 }
 0x330   :  { %v2673_v63 = vpop.f32.mrb[5].mxu1  ;;  %v694_v1 = vadd.f32 %v693_v62, %v643_v61 }
 0x331   :  { %v696_v0 = vpop.f32.mrb[6].mxu1 }
 0x332   :  { %v697_v2 = vadd.f32 %v696_v0, %v643_v61  ;;  %v2674_v3 = vpop.f32.mrb[7].mxu1 }
 0x334   :  { %v3366_v4 = vpack.c.bf16 %v697_v2, %v694_v1 }
 0x336   :  { %702 = vrot.lane.b32.xlu0 %v3366_v4, %s3073_s2 }
 0x33a   :  { %825 = vrot.lane.b32.xlu0 %v3366_v4, %s3074_s29 }
 0x33e   :  { %823 = vrot.lane.b32.xlu0 %v3366_v4, %s3075_s30 }
 0x3a8   :  { %v703_v5 = vpop.permute.xlu0 %702 }
 0x3a9   :  { %v709_v6 = vsel %vm704_vm2, %v703_v5, 0 }
 0x3aa   :  { %2676 = vmatpush3.bf16.xpose.msra.mxu1 %v709_v6 }
 0x3ab   :  { %2681 = vmatprep.subr.bf16.mxu1 %v3071_v32 }
 0x3ac   :  { %v826_v35 = vpop.permute.xlu0 %825 }
 0x3ad   :  { %v831_v37 = vsel %vm704_vm2, %v826_v35, 0 }
 0x3b0   :  { %v824_v38 = vpop.permute.xlu0 %823 }
 0x3b1   :  { %2678 = vmatmul.mubr.msk.bf16.vlgmr.msra.gmra.mrb[8].mxu1 %vm704_vm2, %v3366_v4 }
 0x3b2   :  { %2683 = vmatprep.mubr.msk.bf16.mxu1 %vm3072_vm1, %v3071_v32 }
 0x484   :  { %v745_v8 = vpop.f32.mrb[8].mxu1 }
 0x485   :  { %v746_v10 = vadd.f32 %v745_v8, %v3383_v7  ;;  %v2679_v11 = vpop.f32.mrb[9].mxu1 }
 0x486   :  { %v748_v12 = vpop.f32.mrb[10].mxu1 }
 0x487   :  { %v749_v13 = vadd.f32 %v748_v12, %v3388_v9  ;;  %v2680_v14 = vpop.f32.mrb[11].mxu1  ;;  %v753_v15 = vsel %vm752_vm3, %v746_v10, -inf }
 0x488   :  { %754 = vmax.xlane.f32.xlu1 %v753_v15 }
 0x489   :  { %v756_v16 = vsel %vm752_vm3, %v749_v13, -inf }
 0x48c   :  { %757 = vmax.xlane.f32.xlu1 %v756_v16 }
 0x515   :  { %v755_v17 = vpop.xlane.xlu1 %754 }
 0x516   :  { %v759_v18 = vsub.f32 %v746_v10, %v755_v17 }
 0x518   :  { %v761_v19 = vmul.f32 1.442695, %v759_v18 }
 0x519   :  { %v758_v20 = vpop.xlane.xlu1 %757 }
 0x51a   :  { %2967 = vpow2.f32 %v761_v19  ;;  %v760_v21 = vsub.f32 %v749_v13, %v758_v20 }
 0x51c   :  { %v763_v22 = vmul.f32 1.442695, %v760_v21 }
 0x51e   :  { %2969 = vpow2.f32 %v763_v22 }
 0x524   :  { %v2968_v23 = vpop.eup %2967 }
 0x525   :  { %v765_v24 = vsel %vm752_vm3, %v2968_v23, 0.0 }
 0x526   :  { %766 = vadd.xlane.f32.xlu1 %v765_v24 }
 0x528   :  { %v2970_v25 = vpop.eup %2969 }
 0x529   :  { %v768_v26 = vsel %vm752_vm3, %v2970_v25, 0.0 }
 0x52a   :  { %769 = vadd.xlane.f32.xlu1 %v768_v26 }
 0x53b   :  { %776 = vrot.lane.b32.xlu1 %v3366_v4, %s3076_s4 }
 0x5b3   :  { %v767_v27 = vpop.xlane.xlu1 %766 }
 0x5b4   :  { %2971 = vrcp.f32 %v767_v27 }
 0x5b7   :  { %v770_v28 = vpop.xlane.xlu1 %769 }
 0x5b8   :  { %2973 = vrcp.f32 %v770_v28 }
 0x5bb   :  { %v777_v29 = vpop.permute.xlu1 %776 }
 0x5bc   :  { %2682 = vmatpush3.bf16.msra.mxu1 %v777_v29 }
 0x5bd   :  { %2687 = vmatprep.subr.bf16.mxu1 %v3071_v32 }
 0x5be   :  { %v2972_v30 = vpop.eup %2971 }
 0x5bf   :  { %v773_v33 = vmul.f32 %v2972_v30, %v2968_v23 }
 0x5c2   :  { %v2974_v31 = vpop.eup %2973 }
 0x5c3   :  { %v774_v34 = vmul.f32 %v2974_v31, %v2970_v25 }
 0x5c5   :  { %v775_v36 = vpack.c.bf16 %v774_v34, %v773_v33 }
 0x5c7   :  { %2684 = vmatmul.mubr.msk.bf16.vlgmr.msra.gmra.mrb[12].mxu1 %vm752_vm3, %v775_v36 }
 0x5c8   :  { %2688 = vmatpush3.bf16.xpose.msra.mxu1 %v831_v37  ;;  %2689 = vmatprep.mubr.msk.bf16.mxu1 %vm3072_vm1, %v3071_v32 }
 0x5c9   :  { %2693 = vmatprep.subr.bf16.mxu1 %v3071_v32 }
 0x5cf   :  { %2690 = vmatmul.mubr.msk.bf16.vlgmr.msra.gmra.mrb[16].mxu1 %vm704_vm2, %v824_v38 }
 0x5d0   :  { %2695 = vmatprep.mubr.msk.bf16.mxu1 %vm3072_vm1, %v3071_v32 }
 0x69a   :  { %v3407_v39 = vpop.f32.mrb[12].mxu1 }
 0x69b   :  { %v2685_v41 = vpop.f32.mrb[13].mxu1 }
 0x69c   :  { %v3409_v43 = vpop.f32.mrb[14].mxu1 }
 0x69d   :  { %v2686_v44 = vpop.f32.mrb[15].mxu1 }
 0x6a2   :  { %v867_v45 = vpop.f32.mrb[16].mxu1 }
 0x6a3   :  { %v868_v46 = vadd.f32 %v867_v45, %v3383_v7  ;;  %v2691_v47 = vpop.f32.mrb[17].mxu1 }
 0x6a4   :  { %v870_v48 = vpop.f32.mrb[18].mxu1 }
 0x6a5   :  { %v871_v49 = vadd.f32 %v870_v48, %v3388_v9  ;;  %v2692_v50 = vpop.f32.mrb[19].mxu1  ;;  %v874_v51 = vsel %vm752_vm3, %v868_v46, -inf }
 0x6a6   :  { %875 = vmax.xlane.f32.xlu0 %v874_v51 }
 0x6a7   :  { %v877_v52 = vsel %vm752_vm3, %v871_v49, -inf }
 0x6a8   :  { %878 = vmax.xlane.f32.xlu1 %v877_v52 }
 0x6b9   :  { %946 = vrot.lane.b32.xlu1 %v3366_v4, %s3077_s15 }
 0x6bd   :  { %944 = vrot.lane.b32.xlu1 %v3366_v4, %s3078_s16 }
 0x6c1   :  { %1067 = vrot.lane.b32.xlu1 %v3366_v4, %s3079_s17 }
 0x733   :  { %v876_v53 = vpop.xlane.xlu0 %875 }
 0x734   :  { %v880_v59 = vsub.f32 %v868_v46, %v876_v53 }
 0x735   :  { %v879_v61 = vpop.xlane.xlu1 %878 }
 0x736   :  { %v882_v62 = vmul.f32 1.442695, %v880_v59  ;;  %v881_v63 = vsub.f32 %v871_v49, %v879_v61 }
 0x738   :  { %2975 = vpow2.f32 %v882_v62  ;;  %v884_v0 = vmul.f32 1.442695, %v881_v63 }
 0x739   :  { %v947_v12 = vpop.permute.xlu1 %946 }
 0x73a   :  { %2977 = vpow2.f32 %v884_v0  ;;  %v952_v18 = vsel %vm704_vm2, %v947_v12, 0 }
 0x73d   :  { %v945_v17 = vpop.permute.xlu1 %944 }
 0x741   :  { %v1068_v19 = vpop.permute.xlu1 %1067 }
 0x742   :  { %v2976_v1 = vpop.eup %2975  ;;  %v1073_v20 = vsel %vm704_vm2, %v1068_v19, 0 }
 0x743   :  { %v886_v2 = vsel %vm752_vm3, %v2976_v1, 0.0 }
 0x744   :  { %v2978_v3 = vpop.eup %2977  ;;  %887 = vadd.xlane.f32.xlu0 %v886_v2 }
 0x745   :  { %v889_v5 = vsel %vm752_vm3, %v2978_v3, 0.0 }
 0x748   :  { %890 = vadd.xlane.f32.xlu0 %v889_v5 }
 0x75e   :  { %897 = vrot.lane.b32.xlu0 %v3366_v4, %s3080_s18 }
 0x762   :  { %1065 = vrot.lane.b32.xlu0 %v3366_v4, %s3081_s19 }
 0x7d1   :  { %v888_v6 = vpop.xlane.xlu0 %887 }
 0x7d2   :  { %2979 = vrcp.f32 %v888_v6 }
 0x7d5   :  { %v891_v8 = vpop.xlane.xlu0 %890 }
 0x7d6   :  { %2981 = vrcp.f32 %v891_v8 }
 0x7d9   :  { %v898_v10 = vpop.permute.xlu0 %897 }
 0x7da   :  { %2694 = vmatpush3.bf16.msra.mxu1 %v898_v10 }
 0x7db   :  { %2699 = vmatprep.subr.bf16.mxu1 %v3071_v32 }
 0x7dc   :  { %v2980_v11 = vpop.eup %2979 }
 0x7dd   :  { %v894_v14 = vmul.f32 %v2980_v11, %v2976_v1  ;;  %v1066_v21 = vpop.permute.xlu0 %1065 }
 0x7e0   :  { %v2982_v13 = vpop.eup %2981 }
 0x7e1   :  { %v895_v15 = vmul.f32 %v2982_v13, %v2978_v3 }
 0x7e3   :  { %v896_v16 = vpack.c.bf16 %v895_v15, %v894_v14 }
 0x7e5   :  { %2696 = vmatmul.mubr.msk.bf16.vlgmr.msra.gmra.mrb[20].mxu1 %vm752_vm3, %v896_v16 }
 0x7e6   :  { %2700 = vmatpush3.bf16.xpose.msra.mxu1 %v952_v18  ;;  %2701 = vmatprep.mubr.msk.bf16.mxu1 %vm3072_vm1, %v3071_v32 }
 0x7e7   :  { %2711 = vmatprep.subr.bf16.mxu1 %v3071_v32 }
 0x7ed   :  { %2702 = vmatmul.mubr.msk.bf16.vlgmr.msra.gmra.mrb[24].mxu1 %vm704_vm2, %v945_v17 }
 0x7ee   :  { %2712 = vmatpush3.bf16.xpose.msra.mxu1 %v1073_v20  ;;  %2713 = vmatprep.mubr.msk.bf16.mxu1 %vm3072_vm1, %v3071_v32 }
 0x7ef   :  { %2723 = vmatprep.subr.bf16.mxu1 %v3071_v32 }
 0x7f5   :  { %2714 = vmatmul.mubr.msk.bf16.vlgmr.msra.gmra.mrb[28].mxu1 %vm704_vm2, %v1066_v21 }
 0x7f6   :  { %2727 = vmatprep.mubr.msk.bf16.mxu1 %vm3072_vm1, %v3071_v32 }
 0x8b8   :  { %v937_v22 = vpop.f32.mrb[20].mxu1 }
 0x8b9   :  { %v2697_v23 = vpop.f32.mrb[21].mxu1 }
 0x8ba   :  { %v940_v24 = vpop.f32.mrb[22].mxu1 }
 0x8bb   :  { %v2854_v25 = vpack.i.bf16 %v940_v24, %v937_v22  ;;  %v2698_v26 = vpop.f32.mrb[23].mxu1 }
 0x8c0   :  { %v988_v27 = vpop.f32.mrb[24].mxu1 }
 0x8c1   :  { %v989_v28 = vadd.f32 %v988_v27, %v3383_v7  ;;  %v2703_v29 = vpop.f32.mrb[25].mxu1 }
 0x8c2   :  { %v991_v30 = vpop.f32.mrb[26].mxu1 }
 0x8c3   :  { %v992_v31 = vadd.f32 %v991_v30, %v3388_v9  ;;  %v2704_v33 = vpop.f32.mrb[27].mxu1  ;;  %v995_v34 = vsel %vm752_vm3, %v989_v28, -inf }
 0x8c4   :  { %996 = vmax.xlane.f32.xlu1 %v995_v34 }
 0x8c5   :  { %v998_v35 = vsel %vm752_vm3, %v992_v31, -inf }
 0x8c6   :  { %999 = vmax.xlane.f32.xlu0 %v998_v35  ;;  %v2946_v35 = vld [vmem:[%s3770_s6 + $0x8] sm:$0xff]  }
 0x8c8   :  { %v1109_v36 = vpop.f32.mrb[28].mxu1 }
 0x8c9   :  { %v1110_v37 = vadd.f32 %v1109_v36, %v3383_v7  ;;  %v2715_v38 = vpop.f32.mrb[29].mxu1 }
 0x8ca   :  { %v1112_v41 = vpop.f32.mrb[30].mxu1 }
 0x8cb   :  { %v1113_v44 = vadd.f32 %v1112_v41, %v3388_v9  ;;  %v2716_v45 = vpop.f32.mrb[31].mxu1  ;;  %v1116_v46 = vsel %vm752_vm3, %v1110_v37, -inf }
 0x8cc   :  { %1117 = vmax.xlane.f32.xlu0 %v1116_v46 }
 0x8cd   :  { %v1119_v47 = vsel %vm752_vm3, %v1113_v44, -inf }
 0x8d0   :  { %1120 = vmax.xlane.f32.xlu0 %v1119_v47 }
 0x951   :  { %v997_v48 = vpop.xlane.xlu1 %996 }
 0x952   :  { %v1001_v49 = vsub.f32 %v989_v28, %v997_v48  ;;  %v2945_v28 = vld [vmem:[%s3770_s6] sm:$0xff]  }
 0x953   :  { %v1000_v50 = vpop.xlane.xlu0 %999  ;;  %2724 = vmatpush3.bf16.msra.mxu1 %v2945_v28  ;;  %v2949_v28 = vld [vmem:[%s3772_s8] sm:$0xff]  }
 0x954   :  { %v1003_v51 = vmul.f32 1.442695, %v1001_v49  ;;  %v1002_v52 = vsub.f32 %v992_v31, %v1000_v50  ;;  %2725 = vmatprep.subr.bf16.mxu1 %v3071_v32 }
 0x956   :  { %2983 = vpow2.f32 %v1003_v51  ;;  %v1005_v53 = vmul.f32 1.442695, %v1002_v52 }
 0x957   :  { %2726 = vmatpush3.bf16.msra.mxu1 %v2946_v35 }
 0x958   :  { %2985 = vpow2.f32 %v1005_v53  ;;  %2739 = vmatprep.subr.bf16.mxu1 %v3071_v32 }
 0x959   :  { %v1118_v59 = vpop.xlane.xlu0 %1117 }
 0x95a   :  { %v1122_v61 = vsub.f32 %v1110_v37, %v1118_v59 }
 0x95c   :  { %v1124_v62 = vmul.f32 1.442695, %v1122_v61 }
 0x95d   :  { %v1121_v63 = vpop.xlane.xlu0 %1120 }
 0x95e   :  { %2987 = vpow2.f32 %v1124_v62  ;;  %v1123_v0 = vsub.f32 %v1113_v44, %v1121_v63 }
 0x960   :  { %v2984_v1 = vpop.eup %2983  ;;  %v1126_v2 = vmul.f32 1.442695, %v1123_v0 }
 0x961   :  { %v1007_v3 = vsel %vm752_vm3, %v2984_v1, 0.0 }
 0x962   :  { %v2986_v5 = vpop.eup %2985  ;;  %2989 = vpow2.f32 %v1126_v2  ;;  %1008 = vadd.xlane.f32.xlu1 %v1007_v3 }
 0x963   :  { %v1010_v6 = vsel %vm752_vm3, %v2986_v5, 0.0 }
 0x964   :  { %1011 = vadd.xlane.f32.xlu0 %v1010_v6 }
 0x968   :  { %v2988_v8 = vpop.eup %2987 }
 0x969   :  { %v1128_v10 = vsel %vm752_vm3, %v2988_v8, 0.0 }
 0x96a   :  { %1129 = vadd.xlane.f32.xlu1 %v1128_v10 }
 0x96c   :  { %v2990_v11 = vpop.eup %2989 }
 0x96d   :  { %v1131_v12 = vsel %vm752_vm3, %v2990_v11, 0.0 }
 0x96e   :  { %1132 = vadd.xlane.f32.xlu0 %v1131_v12 }
 0x97b   :  { %1018 = vrot.lane.b32.xlu1 %v3366_v4, %s3082_s20 }
 0x97f   :  { %2855 = vrot.lane.b32.xlu1 %v2854_v25, %s3083_s21 }
 0x984   :  { %1139 = vrot.lane.b32.xlu0 %v3366_v4, %s3084_s22 }
 0x9ef   :  { %v1009_v13 = vpop.xlane.xlu1 %1008 }
 0x9f0   :  { %2991 = vrcp.f32 %v1009_v13 }
 0x9f1   :  { %v1012_v14 = vpop.xlane.xlu0 %1011 }
 0x9f2   :  { %2993 = vrcp.f32 %v1012_v14 }
 0x9f7   :  { %v1130_v15 = vpop.xlane.xlu1 %1129 }
 0x9f8   :  { %2995 = vrcp.f32 %v1130_v15 }
 0x9fa   :  { %v2992_v16 = vpop.eup %2991 }
 0x9fb   :  { %v1019_v17 = vpop.permute.xlu1 %1018  ;;  %v1133_v18 = vpop.xlane.xlu0 %1132  ;;  %v1015_v20 = vmul.f32 %v2992_v16, %v2984_v1  ;;  %v3087_v16 = vmov 0  }
 0x9fc   :  { %v2994_v19 = vpop.eup %2993  ;;  %2997 = vrcp.f32 %v1133_v18  ;;  %2706 = vmatpush3.bf16.msra.mxu0 %v1019_v17  ;;  %2869 = vset.pattern.permute.xlu0 %v3087_v16  ;;  %v632_v17 = vld [vmem:[%s3767_s3 + $0x8] sm:$0xff] }
 0x9fd   :  { %v1016_v21 = vmul.f32 %v2994_v19, %v2986_v5  ;;  %2717 = vmatprep.subr.bf16.mxu0 %v3071_v32  ;;  %2870 = vset.pattern.permute.xlu1 %v3087_v16 }
 0x9ff   :  { %v1140_v22 = vpop.permute.xlu0 %1139  ;;  %v1017_v23 = vpack.c.bf16 %v1016_v21, %v1015_v20  ;;  %v2856_v45 = vpop.permute.xlu1 %2855 }
 0xa00   :  { %v2858_v47 = vunpack.i.h.bf16 %v2856_v45  ;;  %v2857_v48 = vunpack.i.l.bf16 %v2856_v45 }
 0xa01   :  { %2708 = vmatmul.mubr.msk.bf16.vlgmr.msra.gmra.mrb[8].mxu0 %vm752_vm3, %v1017_v23 }
 0xa02   :  { %2718 = vmatpush3.bf16.msra.mxu0 %v1140_v22  ;;  %2719 = vmatprep.mubr.msk.bf16.mxu0 %vm3072_vm1, %v3071_v32  ;;  %v2996_v4 = vpop.eup %2995  ;;  %v1211_v52 = vsel %vm704_vm2, %v3409_v43, %v2858_v47  ;;  %v1210_v53 = vsel %vm704_vm2, %v3407_v39, %v2857_v48  ;;  %v1224_v43 = vsub.s32 4, %v3307_v55 }
 0xa03   :  { %2731 = vmatprep.subr.bf16.mxu0 %v3071_v32  ;;  %v1136_v25 = vmul.f32 %v2996_v4, %v2988_v8 }
 0xa04   :  { %v1225_v39 = vrot.slane %v3315_v57, %v1224_v43 }
 0xa06   :  { %v2998_v24 = vpop.eup %2997 }
 0xa07   :  { %v1137_v26 = vmul.f32 %v2998_v24, %v2990_v11 }
 0xa09   :  { %v1138_v27 = vpack.c.bf16 %v1137_v26, %v1136_v25  ;;  %v631_v25 = vld [vmem:[%s3767_s3] sm:$0xff] }
 0xa0a   :  { %v2947_v26 = vld [vmem:[%s3771_s7] sm:$0xff]  }
 0xa0b   :  { %2720 = vmatmul.mubr.msk.bf16.vlgmr.msra.gmra.mrb[12].mxu0 %vm752_vm3, %v1138_v27  ;;  %v2948_v27 = vld [vmem:[%s3771_s7 + $0x8] sm:$0xff]  }
 0xa0c   :  { %2735 = vmatprep.mubr.msk.bf16.mxu0 %vm3072_vm1, %v3071_v32  ;;  %2732 = vmatpush3.bf16.msra.mxu0 %v2947_v26 }
 0xa0d   :  { %2733 = vmatprep.subr.bf16.mxu0 %v3071_v32 }
 0xa10   :  { %2734 = vmatpush3.bf16.msra.mxu0 %v2948_v27 }
 0xa11   :  { %2751 = vmatprep.subr.bf16.mxu0 %v3071_v32 }
 0xad4   :  { %v1058_v29 = vpop.f32.mrb[8].mxu0 }
 0xad5   :  { %v2709_v30 = vpop.f32.mrb[9].mxu0 }
 0xad6   :  { %v1061_v31 = vpop.f32.mrb[10].mxu0 }
 0xad7   :  { %v2859_v33 = vpack.i.bf16 %v1061_v31, %v1058_v29  ;;  %v2710_v34 = vpop.f32.mrb[11].mxu0  ;;  %v2950_v29 = vld [vmem:[%s3772_s8 + $0x8] sm:$0xff]  }
 0xad9   :  { %2860 = vrot.lane.b32.xlu1 %v2859_v33, %s3085_s25 }
 0xade   :  { %v1179_v36 = vpop.f32.mrb[12].mxu0 }
 0xadf   :  { %v2721_v37 = vpop.f32.mrb[13].mxu0 }
 0xae0   :  { %v1182_v38 = vpop.f32.mrb[14].mxu0  ;;  %v1312_v37 = vsub.s32 5, %v3307_v55 }
 0xae1   :  { %v2864_v41 = vpack.i.bf16 %v1182_v38, %v1179_v36  ;;  %v2722_v44 = vpop.f32.mrb[15].mxu0 }
 0xae2   :  { %v1313_v38 = vrot.slane %v3315_v57, %v1312_v37 }
 0xae3   :  { %2865 = vrot.lane.b32.xlu1 %v2864_v41, %s3086_s26  ;;  %v1318_v41 = vsub.s32 6, %v3307_v55 }
 0xae5   :  { %v1319_v47 = vrot.slane %v3315_v57, %v1318_v41 }
 0xb4b   :  { %v2861_v46 = vpop.permute.xlu1 %2860 }
 0xb4c   :  { %v2863_v49 = vunpack.i.h.bf16 %v2861_v46  ;;  %v2862_v50 = vunpack.i.l.bf16 %v2861_v46 }
 0xb4e   :  { %v1213_v62 = vsel %vm752_vm3, %v1211_v52, %v2863_v49  ;;  %v1212_v63 = vsel %vm752_vm3, %v1210_v53, %v2862_v50 }
 0xb55   :  { %v2866_v51 = vpop.permute.xlu1 %2865 }
 0xb56   :  { %v2868_v59 = vunpack.i.h.bf16 %v2866_v51  ;;  %v2867_v61 = vunpack.i.l.bf16 %v2866_v51 }
 0xb58   :  { %v1216_v0 = vsel %vm1214_vm4, %v1213_v62, %v2868_v59  ;;  %v1215_v1 = vsel %vm1214_vm4, %v1212_v63, %v2867_v61 }
 0xb59   :  { %v1217_v2 = vpack.c.bf16 %v1216_v0, %v1215_v1  ;;  %v2951_v0 = vld [vmem:[%s3772_s8 + $0x10] sm:$0xff]   ;;  %v2952_v1 = vld [vmem:[%s3772_s8 + $0x18] sm:$0xff]  }
 0xb5b   :  { %2728 = vmatmul.mubr.msk.bf16.vlgmr.msra.gmra.mrb[32].mxu1 %vm587_vm0, %v1217_v2  ;;  %v1341_v2 = vsub.s32 7, %v3307_v55 }
 0xb5c   :  { %2747 = vmatprep.mubr.msk.bf16.mxu1 %vm3072_vm1, %v3071_v32  ;;  %2740 = vmatpush3.bf16.msra.mxu1 %v2949_v28 }
 0xb5d   :  { %2741 = vmatprep.subr.bf16.mxu1 %v3071_v32 }
 0xb60   :  { %2742 = vmatpush3.bf16.msra.mxu1 %v2950_v29 }
 0xb61   :  { %2743 = vmatprep.subr.bf16.mxu1 %v3071_v32 }
 0xb64   :  { %2744 = vmatpush3.bf16.msra.mxu1 %v2951_v0 }
 0xb65   :  { %2745 = vmatprep.subr.bf16.mxu1 %v3071_v32 }
 0xb68   :  { %2746 = vmatpush3.bf16.msra.mxu1 %v2952_v1 }
 0xb69   :  { %2765 = vmatprep.subr.bf16.mxu1 %v3071_v32 }
 0xc2e   :  { %v1275_v3 = vpop.f32.mrb[32].mxu1 }
 0xc2f   :  { %v1276_v5 = vadd.f32 %v1275_v3, %v1225_v39  ;;  %v2729_v6 = vpop.f32.mrb[33].mxu1 }
 0xc30   :  { %v1278_v8 = vpop.f32.mrb[34].mxu1 }
 0xc31   :  { %v1279_v10 = vadd.f32 %v1278_v8, %v1225_v39  ;;  %v2730_v11 = vpop.f32.mrb[35].mxu1  ;;  %v1282_v12 = vadd.f32 %v1276_v5, %v3353_v54  ;;  %v1342_v39 = vrot.slane %v3315_v57, %v1341_v2 }
 0xc33   :  { %v1284_v13 = vsel %vm587_vm0, %v1282_v12, 0.0  ;;  %v1283_v14 = vadd.f32 %v1279_v10, %v3355_v58 }
 0xc34   :  { %1285 = vadd.xlane.f32.xlu0 %v1284_v13 }
 0xc35   :  { %v1287_v15 = vsel %vm587_vm0, %v1283_v14, 0.0 }
 0xc36   :  { %1288 = vadd.xlane.f32.xlu1 %v1287_v15  ;;  %v3554_v15 = vld [vmem:[%s3773_s9 + $0x8] sm:$0xff] }
 0xc37   :  { %v1413_v57 = vrot.slane %v3554_v15, %v3310_v56 }
 0xc47   :  { %1329 = vperm.xlu1 %2870, %v632_v17  }
 0xcc1   :  { %v1286_v18 = vpop.xlane.xlu0 %1285 }
 0xcc2   :  { %v1290_v19 = vmul.f32 0.03125, %v1286_v18 }
 0xcc3   :  { %v1289_v20 = vpop.xlane.xlu1 %1288 }
 0xcc4   :  { %v1292_v54 = vsub.f32 %v1282_v12, %v1290_v19  ;;  %v1291_v21 = vmul.f32 0.03125, %v1289_v20 }
 0xcc6   :  { %v1293_v22 = vsub.f32 %v1283_v14, %v1291_v21  ;;  %v1294_v23 = vmul.f32 %v1292_v54, %v1292_v54 }
 0xcc7   :  { %v3529_v53 = vpop.permute.xlu1 %1329 }
 0xcc8   :  { %v1296_v58 = vsel %vm587_vm0, %v1294_v23, 0.0  ;;  %v1295_v4 = vmul.f32 %v1293_v22, %v1293_v22 }
 0xcc9   :  { %1297 = vadd.xlane.f32.xlu0 %v1296_v58 }
 0xcca   :  { %v1299_v24 = vsel %vm587_vm0, %v1295_v4, 0.0 }
 0xccd   :  { %1300 = vadd.xlane.f32.xlu0 %v1299_v24 }
 0xce3   :  { %1324 = vperm.xlu0 %2869, %v631_v25  }
 0xd56   :  { %v1298_v30 = vpop.xlane.xlu0 %1297 }
 0xd57   :  { %v1302_v31 = vmul.f32 0.03125, %v1298_v30 }
 0xd59   :  { %v1304_v33 = vadd.f32 1e-05, %v1302_v31 }
 0xd5a   :  { %v1301_v34 = vpop.xlane.xlu0 %1300 }
 0xd5b   :  { %2999 = vrsqrt.f32 %v1304_v33  ;;  %v1303_v35 = vmul.f32 0.03125, %v1301_v34  ;;  %v2953_v34 = vld [vmem:[%s3769_s5 + $0x10] sm:$0xff]  }
 0xd5d   :  { %v1305_v36 = vadd.f32 1e-05, %v1303_v35  ;;  %v2954_v35 = vld [vmem:[%s3769_s5 + $0x18] sm:$0xff]  }
 0xd5f   :  { %3001 = vrsqrt.f32 %v1305_v36 }
 0xd62   :  { %v3527_v52 = vpop.permute.xlu0 %1324 }
 0xd65   :  { %v3000_v44 = vpop.eup %2999 }
 0xd66   :  { %v1308_v45 = vmul.f32 %v3000_v44, %v1292_v54 }
 0xd68   :  { %v1314_v46 = vmul.f32 %v1313_v38, %v1308_v45 }
 0xd69   :  { %v3002_v48 = vpop.eup %3001 }
 0xd6a   :  { %v1309_v49 = vmul.f32 %v3002_v48, %v1293_v22  ;;  %v1320_v50 = vadd.f32 %v1319_v47, %v1314_v46  ;;  %v1514_v48 = vrot.slane %v3554_v15, %v3338_v40 }
 0xd6c   :  { %v1315_v51 = vmul.f32 %v1313_v38, %v1309_v49  ;;  %v1332_v61 = vmul.f32 %v3527_v52, %v1320_v50 }
 0xd6e   :  { %v1321_v59 = vadd.f32 %v1319_v47, %v1315_v51 }
 0xd70   :  { %v1333_v62 = vmul.f32 %v3529_v53, %v1321_v59  ;;  %v1520_v59 = vrot.slane %v3554_v15, %v3343_v42 }
 0xd72   :  { %v1334_v63 = vpack.c.bf16 %v1333_v62, %v1332_v61 }
 0xd74   :  { %2736 = vmatmul.mubr.msk.bf16.vlgmr.msra.gmra.mrb[16].mxu0 %vm587_vm0, %v1334_v63 }
 0xd75   :  { %2755 = vmatprep.mubr.msk.bf16.mxu0 %vm3072_vm1, %v3071_v32  ;;  %2752 = vmatpush3.bf16.msra.mxu0 %v2953_v34 }
 0xd76   :  { %2753 = vmatprep.subr.bf16.mxu0 %v3071_v32 }
 0xd79   :  { %2754 = vmatpush3.bf16.msra.mxu0 %v2954_v35 }
 0xd7a   :  { %2759 = vmatprep.subr.bf16.mxu0 %v3071_v32 }
 0xe47   :  { %v1392_v3 = vpop.f32.mrb[16].mxu0 }
 0xe48   :  { %v1393_v5 = vadd.f32 %v1392_v3, %v1342_v39  ;;  %v2737_v6 = vpop.f32.mrb[17].mxu0 }
 0xe49   :  { %v1395_v8 = vpop.f32.mrb[18].mxu0  ;;  %v1534_v6 = vrot.slane %v3554_v15, %v642_v60 }
 0xe4a   :  { %v1396_v10 = vadd.f32 %v1395_v8, %v1342_v39  ;;  %v2738_v11 = vpop.f32.mrb[19].mxu0  ;;  %v1399_v12 = vmax.f32 %v1393_v5, 0.0 }
 0xe4c   :  { %v1400_v13 = vmax.f32 %v1396_v10, 0.0 }
 0xe4e   :  { %v1401_v14 = vpack.c.bf16 %v1400_v13, %v1399_v12 }
 0xe50   :  { %2748 = vmatmul.mubr.msk.bf16.vlgmr.msra.gmra.mrb[36].mxu1 %vm1438_vm5, %v1401_v14 }
 0xe51   :  { %2767 = vmatprep.mubr.msk.bf16.mxu1 %vm3072_vm1, %v3071_v32 }
 0xf23   :  { %v1476_v16 = vpop.f32.mrb[36].mxu1 }
 0xf24   :  { %v1477_v17 = vadd.f32 %v1476_v16, %v1413_v57  ;;  %v2749_v18 = vpop.f32.mrb[37].mxu1 }
 0xf25   :  { %v1479_v19 = vpop.f32.mrb[38].mxu1 }
 0xf26   :  { %v1480_v20 = vadd.f32 %v1479_v19, %v1413_v57  ;;  %v2750_v54 = vpop.f32.mrb[39].mxu1  ;;  %v1483_v21 = vadd.f32 %v1477_v17, %v1332_v61 }
 0xf28   :  { %v1485_v22 = vsel %vm587_vm0, %v1483_v21, 0.0  ;;  %v1484_v23 = vadd.f32 %v1480_v20, %v1333_v62 }
 0xf29   :  { %1486 = vadd.xlane.f32.xlu1 %v1485_v22 }
 0xf2a   :  { %v1488_v58 = vsel %vm587_vm0, %v1484_v23, 0.0 }
 0xf2b   :  { %1489 = vadd.xlane.f32.xlu0 %v1488_v58 }
 0xfb6   :  { %v1487_v4 = vpop.xlane.xlu1 %1486 }
 0xfb7   :  { %v1491_v24 = vmul.f32 0.03125, %v1487_v4 }
 0xfb8   :  { %v1490_v25 = vpop.xlane.xlu0 %1489 }
 0xfb9   :  { %v1493_v26 = vsub.f32 %v1483_v21, %v1491_v24  ;;  %v1492_v27 = vmul.f32 0.03125, %v1490_v25 }
 0xfbb   :  { %v1494_v28 = vsub.f32 %v1484_v23, %v1492_v27  ;;  %v1495_v29 = vmul.f32 %v1493_v26, %v1493_v26 }
 0xfbd   :  { %v1497_v30 = vsel %vm587_vm0, %v1495_v29, 0.0  ;;  %v1496_v31 = vmul.f32 %v1494_v28, %v1494_v28 }
 0xfbe   :  { %1498 = vadd.xlane.f32.xlu1 %v1497_v30 }
 0xfbf   :  { %v1500_v33 = vsel %vm587_vm0, %v1496_v31, 0.0 }
 0xfc2   :  { %1501 = vadd.xlane.f32.xlu1 %v1500_v33 }
0x104b   :  { %v1499_v36 = vpop.xlane.xlu1 %1498 }
0x104c   :  { %v1503_v38 = vmul.f32 0.03125, %v1499_v36 }
0x104e   :  { %v1505_v44 = vadd.f32 1e-05, %v1503_v38 }
0x104f   :  { %v1502_v45 = vpop.xlane.xlu1 %1501 }
0x1050   :  { %3003 = vrsqrt.f32 %v1505_v44  ;;  %v1504_v46 = vmul.f32 0.03125, %v1502_v45 }
0x1052   :  { %v1506_v47 = vadd.f32 1e-05, %v1504_v46 }
0x1054   :  { %3005 = vrsqrt.f32 %v1506_v47 }
0x105a   :  { %v3004_v49 = vpop.eup %3003 }
0x105b   :  { %v1509_v50 = vmul.f32 %v3004_v49, %v1493_v26 }
0x105d   :  { %v1515_v51 = vmul.f32 %v1514_v48, %v1509_v50 }
0x105e   :  { %v3006_v61 = vpop.eup %3005 }
0x105f   :  { %v1510_v62 = vmul.f32 %v3006_v61, %v1494_v28  ;;  %v1521_v0 = vadd.f32 %v1520_v59, %v1515_v51 }
0x1061   :  { %v1516_v63 = vmul.f32 %v1514_v48, %v1510_v62  ;;  %v3575_v39 = vmul.f32 %v1521_v0, %v3527_v52 }
0x1063   :  { %v1522_v1 = vadd.f32 %v1520_v59, %v1516_v63 }
0x1065   :  { %v3578_v3 = vmul.f32 %v1522_v1, %v3529_v53 }
0x1067   :  { %v1525_v5 = vpack.c.bf16 %v3578_v3, %v3575_v39 }
0x1069   :  { %2756 = vmatmul.mubr.msk.bf16.vlgmr.msra.gmra.mrb[20].mxu0 %vm587_vm0, %v1525_v5 }
0x106a   :  { %2761 = vmatprep.mubr.msk.bf16.mxu0 %vm3072_vm1, %v3071_v32 }
0x113c   :  { %v1584_v8 = vpop.f32.mrb[20].mxu0 }
0x113d   :  { %v2757_v10 = vpop.f32.mrb[21].mxu0  ;;  %v1585_v12 = vadd.f32 %v1584_v8, %v1534_v6 }
0x113e   :  { %v1587_v11 = vpop.f32.mrb[22].mxu0 }
0x113f   :  { %v1588_v13 = vadd.f32 %v1587_v11, %v1534_v6  ;;  %v2758_v14 = vpop.f32.mrb[23].mxu0 }
0x1141   :  { %v3588_v57 = vpack.c.bf16 %v1588_v13, %v1585_v12 }
0x1143   :  { %1714 = vrot.lane.b32.xlu0 %v3588_v57, %s3074_s29  ;;  %1593 = vrot.lane.b32.xlu1 %v3588_v57, %s3073_s2 }
0x1147   :  { %1712 = vrot.lane.b32.xlu1 %v3588_v57, %s3075_s30 }
0x114b   :  { %1835 = vrot.lane.b32.xlu1 %v3588_v57, %s3077_s15 }
0x114f   :  { %1833 = vrot.lane.b32.xlu1 %v3588_v57, %s3078_s16 }
0x1153   :  { %1956 = vrot.lane.b32.xlu1 %v3588_v57, %s3079_s17 }
0x1157   :  { %1954 = vrot.lane.b32.xlu1 %v3588_v57, %s3081_s19 }
0x11b5   :  { %v1594_v60 = vpop.permute.xlu1 %1593  ;;  %v1715_v18 = vpop.permute.xlu0 %1714 }
0x11b6   :  { %v1599_v16 = vsel %vm704_vm2, %v1594_v60, 0  ;;  %v1720_v19 = vsel %vm704_vm2, %v1715_v18, 0 }
0x11b7   :  { %2760 = vmatpush3.bf16.xpose.msra.mxu0 %v1599_v16 }
0x11b8   :  { %2771 = vmatprep.subr.bf16.mxu0 %v3071_v32 }
0x11b9   :  { %v1713_v17 = vpop.permute.xlu1 %1712 }
0x11bd   :  { %v1836_v20 = vpop.permute.xlu1 %1835 }
0x11be   :  { %2762 = vmatmul.mubr.msk.bf16.vlgmr.msra.gmra.mrb[24].mxu0 %vm704_vm2, %v3588_v57  ;;  %v1841_v21 = vsel %vm704_vm2, %v1836_v20, 0 }
0x11bf   :  { %2772 = vmatpush3.bf16.xpose.msra.mxu0 %v1720_v19  ;;  %2773 = vmatprep.mubr.msk.bf16.mxu0 %vm3072_vm1, %v3071_v32 }
0x11c0   :  { %2783 = vmatprep.subr.bf16.mxu0 %v3071_v32 }
0x11c1   :  { %v1834_v54 = vpop.permute.xlu1 %1833 }
0x11c5   :  { %v1957_v22 = vpop.permute.xlu1 %1956 }
0x11c6   :  { %2774 = vmatmul.mubr.msk.bf16.vlgmr.msra.gmra.mrb[28].mxu0 %vm704_vm2, %v1713_v17  ;;  %v1962_v23 = vsel %vm704_vm2, %v1957_v22, 0 }
0x11c7   :  { %2784 = vmatpush3.bf16.xpose.msra.mxu0 %v1841_v21  ;;  %2785 = vmatprep.mubr.msk.bf16.mxu0 %vm3072_vm1, %v3071_v32 }
0x11c8   :  { %2795 = vmatprep.subr.bf16.mxu0 %v3071_v32 }
0x11c9   :  { %v1955_v58 = vpop.permute.xlu1 %1954 }
0x11ce   :  { %2786 = vmatmul.mubr.msk.bf16.vlgmr.msra.gmra.mrb[32].mxu0 %vm704_vm2, %v1834_v54 }
0x11cf   :  { %2796 = vmatpush3.bf16.xpose.msra.mxu0 %v1962_v23  ;;  %2797 = vmatprep.mubr.msk.bf16.mxu0 %vm3072_vm1, %v3071_v32 }
0x11d0   :  { %2807 = vmatprep.subr.bf16.mxu0 %v3071_v32 }
0x11d6   :  { %2798 = vmatmul.mubr.msk.bf16.vlgmr.msra.gmra.mrb[36].mxu0 %vm704_vm2, %v1955_v58 }
0x11d7   :  { %2811 = vmatprep.mubr.msk.bf16.mxu0 %vm3072_vm1, %v3071_v32 }
0x1291   :  { %v1635_v4 = vpop.f32.mrb[24].mxu0 }
0x1292   :  { %v1636_v24 = vadd.f32 %v1635_v4, %v3383_v7  ;;  %v2763_v25 = vpop.f32.mrb[25].mxu0 }
0x1293   :  { %v1638_v26 = vpop.f32.mrb[26].mxu0 }
0x1294   :  { %v1639_v27 = vadd.f32 %v1638_v26, %v3388_v9  ;;  %v2764_v28 = vpop.f32.mrb[27].mxu0  ;;  %v1642_v29 = vsel %vm752_vm3, %v1636_v24, -inf }
0x1295   :  { %1643 = vmax.xlane.f32.xlu0 %v1642_v29 }
0x1296   :  { %v1645_v30 = vsel %vm752_vm3, %v1639_v27, -inf }
0x1297   :  { %1646 = vmax.xlane.f32.xlu1 %v1645_v30 }
0x1299   :  { %v1756_v31 = vpop.f32.mrb[28].mxu0 }
0x129a   :  { %v1757_v33 = vadd.f32 %v1756_v31, %v3383_v7  ;;  %v2775_v34 = vpop.f32.mrb[29].mxu0 }
0x129b   :  { %v1759_v35 = vpop.f32.mrb[30].mxu0 }
0x129c   :  { %v1760_v36 = vadd.f32 %v1759_v35, %v3388_v9  ;;  %v2776_v38 = vpop.f32.mrb[31].mxu0  ;;  %v1763_v44 = vsel %vm752_vm3, %v1757_v33, -inf }
0x129d   :  { %1764 = vmax.xlane.f32.xlu0 %v1763_v44 }
0x129e   :  { %v1766_v45 = vsel %vm752_vm3, %v1760_v36, -inf }
0x12a1   :  { %1767 = vmax.xlane.f32.xlu0 %v1766_v45  ;;  %v1877_v46 = vpop.f32.mrb[32].mxu0 }
0x12a2   :  { %v1878_v47 = vadd.f32 %v1877_v46, %v3383_v7  ;;  %v2787_v48 = vpop.f32.mrb[33].mxu0 }
0x12a3   :  { %v1880_v49 = vpop.f32.mrb[34].mxu0 }
0x12a4   :  { %v1881_v50 = vadd.f32 %v1880_v49, %v3388_v9  ;;  %v2788_v51 = vpop.f32.mrb[35].mxu0  ;;  %v1884_v59 = vsel %vm752_vm3, %v1878_v47, -inf }
0x12a5   :  { %1885 = vmax.xlane.f32.xlu1 %v1884_v59 }
0x12a6   :  { %v1887_v61 = vsel %vm752_vm3, %v1881_v50, -inf }
0x12a7   :  { %1888 = vmax.xlane.f32.xlu0 %v1887_v61 }
0x12a9   :  { %v1998_v62 = vpop.f32.mrb[36].mxu0 }
0x12aa   :  { %v1999_v63 = vadd.f32 %v1998_v62, %v3383_v7  ;;  %v2799_v0 = vpop.f32.mrb[37].mxu0 }
0x12ab   :  { %v2001_v1 = vpop.f32.mrb[38].mxu0 }
0x12ac   :  { %v2002_v5 = vadd.f32 %v2001_v1, %v3388_v9  ;;  %v2800_v6 = vpop.f32.mrb[39].mxu0  ;;  %v2005_v8 = vsel %vm752_vm3, %v1999_v63, -inf }
0x12ad   :  { %2006 = vmax.xlane.f32.xlu1 %v2005_v8 }
0x12ae   :  { %v2008_v10 = vsel %vm752_vm3, %v2002_v5, -inf }
0x12af   :  { %2009 = vmax.xlane.f32.xlu0 %v2008_v10 }
0x12be   :  { %1665 = vrot.lane.b32.xlu1 %v3588_v57, %s3076_s4 }
0x1322   :  { %v1644_v11 = vpop.xlane.xlu0 %1643 }
0x1323   :  { %v1648_v12 = vsub.f32 %v1636_v24, %v1644_v11 }
0x1324   :  { %v1647_v13 = vpop.xlane.xlu1 %1646 }
0x1325   :  { %v1650_v14 = vmul.f32 1.442695, %v1648_v12  ;;  %v1649_v60 = vsub.f32 %v1639_v27, %v1647_v13 }
0x1327   :  { %3007 = vpow2.f32 %v1650_v14  ;;  %v1652_v7 = vmul.f32 1.442695, %v1649_v60 }
0x1329   :  { %3009 = vpow2.f32 %v1652_v7 }
0x132a   :  { %v1765_v16 = vpop.xlane.xlu0 %1764 }
0x132b   :  { %v1769_v9 = vsub.f32 %v1757_v33, %v1765_v16 }
0x132d   :  { %v1771_v17 = vmul.f32 1.442695, %v1769_v9 }
0x132e   :  { %v1768_v18 = vpop.xlane.xlu0 %1767 }
0x132f   :  { %3011 = vpow2.f32 %v1771_v17  ;;  %v1770_v19 = vsub.f32 %v1760_v36, %v1768_v18 }
0x1331   :  { %v3008_v20 = vpop.eup %3007  ;;  %v1773_v54 = vmul.f32 1.442695, %v1770_v19 }
0x1332   :  { %v1886_v21 = vpop.xlane.xlu1 %1885  ;;  %v1654_v22 = vsel %vm752_vm3, %v3008_v20, 0.0 }
0x1333   :  { %v3010_v23 = vpop.eup %3009  ;;  %3013 = vpow2.f32 %v1773_v54  ;;  %v1890_v58 = vsub.f32 %v1878_v47, %v1886_v21  ;;  %1655 = vadd.xlane.f32.xlu1 %v1654_v22 }
0x1334   :  { %v1889_v4 = vpop.xlane.xlu0 %1888  ;;  %v1657_v24 = vsel %vm752_vm3, %v3010_v23, 0.0 }
0x1335   :  { %v1892_v25 = vmul.f32 1.442695, %v1890_v58  ;;  %v1891_v26 = vsub.f32 %v1881_v50, %v1889_v4  ;;  %1658 = vadd.xlane.f32.xlu0 %v1657_v24 }
0x1337   :  { %3015 = vpow2.f32 %v1892_v25  ;;  %v1894_v27 = vmul.f32 1.442695, %v1891_v26 }
0x1339   :  { %v3012_v28 = vpop.eup %3011  ;;  %3017 = vpow2.f32 %v1894_v27 }
0x133a   :  { %v2007_v29 = vpop.xlane.xlu1 %2006  ;;  %v1775_v30 = vsel %vm752_vm3, %v3012_v28, 0.0 }
0x133b   :  { %v2011_v31 = vsub.f32 %v1999_v63, %v2007_v29  ;;  %1776 = vadd.xlane.f32.xlu1 %v1775_v30 }
0x133c   :  { %v2010_v33 = vpop.xlane.xlu0 %2009 }
0x133d   :  { %v3014_v34 = vpop.eup %3013  ;;  %v2013_v35 = vmul.f32 1.442695, %v2011_v31  ;;  %v2012_v36 = vsub.f32 %v2002_v5, %v2010_v33 }
0x133e   :  { %v1666_v38 = vpop.permute.xlu1 %1665  ;;  %v1778_v44 = vsel %vm752_vm3, %v3014_v34, 0.0 }
0x133f   :  { %3019 = vpow2.f32 %v2013_v35  ;;  %v2015_v45 = vmul.f32 1.442695, %v2012_v36  ;;  %2766 = vmatpush3.bf16.msra.mxu1 %v1666_v38  ;;  %1779 = vadd.xlane.f32.xlu0 %v1778_v44  ;;  %v2955_v36 = vld [vmem:[%s3770_s6 + $0x10] sm:$0xff]  }
0x1340   :  { %2777 = vmatprep.subr.bf16.mxu1 %v3071_v32  ;;  %2808 = vmatpush3.bf16.msra.mxu0 %v2955_v36  ;;  %v2959_v36 = vld [vmem:[%s3772_s8 + $0x20] sm:$0xff]  }
0x1341   :  { %v3016_v46 = vpop.eup %3015  ;;  %3021 = vpow2.f32 %v2015_v45  ;;  %2809 = vmatprep.subr.bf16.mxu0 %v3071_v32 }
0x1342   :  { %v1896_v47 = vsel %vm752_vm3, %v3016_v46, 0.0 }
0x1343   :  { %v3018_v48 = vpop.eup %3017  ;;  %1897 = vadd.xlane.f32.xlu1 %v1896_v47  ;;  %v2956_v47 = vld [vmem:[%s3770_s6 + $0x18] sm:$0xff]  }
0x1344   :  { %v1899_v49 = vsel %vm752_vm3, %v3018_v48, 0.0  ;;  %2810 = vmatpush3.bf16.msra.mxu0 %v2956_v47 }
0x1345   :  { %1900 = vadd.xlane.f32.xlu0 %v1899_v49  ;;  %2823 = vmatprep.subr.bf16.mxu0 %v3071_v32 }
0x1349   :  { %v3020_v50 = vpop.eup %3019 }
0x134a   :  { %v2017_v51 = vsel %vm752_vm3, %v3020_v50, 0.0 }
0x134b   :  { %v3022_v59 = vpop.eup %3021  ;;  %2018 = vadd.xlane.f32.xlu1 %v2017_v51 }
0x134c   :  { %v2020_v61 = vsel %vm752_vm3, %v3022_v59, 0.0 }
0x134d   :  { %2021 = vadd.xlane.f32.xlu0 %v2020_v61 }
0x135c   :  { %1907 = vrot.lane.b32.xlu1 %v3588_v57, %s3082_s20 }
0x1360   :  { %2028 = vrot.lane.b32.xlu1 %v3588_v57, %s3084_s22 }
0x1363   :  { %1786 = vrot.lane.b32.xlu0 %v3588_v57, %s3080_s18 }
0x13c0   :  { %v1656_v62 = vpop.xlane.xlu1 %1655 }
0x13c1   :  { %3023 = vrcp.f32 %v1656_v62 }
0x13c2   :  { %v1659_v63 = vpop.xlane.xlu0 %1658 }
0x13c3   :  { %3025 = vrcp.f32 %v1659_v63 }
0x13c8   :  { %v1777_v10 = vpop.xlane.xlu1 %1776 }
0x13cb   :  { %v3024_v0 = vpop.eup %3023 }
0x13cc   :  { %v1780_v1 = vpop.xlane.xlu0 %1779  ;;  %v1662_v6 = vmul.f32 %v3024_v0, %v3008_v20 }
0x13cd   :  { %v3026_v5 = vpop.eup %3025  ;;  %3027 = vrcp.f32 %v1780_v1 }
0x13ce   :  { %v1663_v8 = vmul.f32 %v3026_v5, %v3010_v23  ;;  %3029 = vrcp.f32 %v1777_v10 }
0x13d0   :  { %v1664_v11 = vpack.c.bf16 %v1663_v8, %v1662_v6  ;;  %v1898_v57 = vpop.xlane.xlu1 %1897 }
0x13d2   :  { %2768 = vmatmul.mubr.msk.bf16.vlgmr.msra.gmra.mrb[40].mxu1 %vm752_vm3, %v1664_v11  ;;  %v1901_v12 = vpop.xlane.xlu0 %1900 }
0x13d3   :  { %2779 = vmatprep.mubr.msk.bf16.mxu1 %vm3072_vm1, %v3071_v32  ;;  %3031 = vrcp.f32 %v1901_v12 }
0x13d4   :  { %3033 = vrcp.f32 %v1898_v57 }
0x13d7   :  { %v3028_v13 = vpop.eup %3027 }
0x13d8   :  { %v3030_v60 = vpop.eup %3029  ;;  %v1784_v7 = vmul.f32 %v3028_v13, %v3014_v34  ;;  %v2019_v16 = vpop.xlane.xlu1 %2018 }
0x13d9   :  { %v1783_v9 = vmul.f32 %v3030_v60, %v3012_v28 }
0x13da   :  { %v2022_v14 = vpop.xlane.xlu0 %2021 }
0x13db   :  { %3035 = vrcp.f32 %v2022_v14  ;;  %v1785_v18 = vpack.c.bf16 %v1784_v7, %v1783_v9 }
0x13dc   :  { %3037 = vrcp.f32 %v2019_v16  ;;  %v1908_v20 = vpop.permute.xlu1 %1907 }
0x13dd   :  { %v3032_v19 = vpop.eup %3031 }
0x13de   :  { %v1787_v17 = vpop.permute.xlu0 %1786  ;;  %v3034_v54 = vpop.eup %3033  ;;  %v1905_v21 = vmul.f32 %v3032_v19, %v3018_v48 }
0x13df   :  { %2778 = vmatpush3.bf16.msra.mxu1 %v1787_v17  ;;  %v1904_v22 = vmul.f32 %v3034_v54, %v3016_v46 }
0x13e0   :  { %2789 = vmatprep.subr.bf16.mxu1 %v3071_v32  ;;  %v2029_v4 = vpop.permute.xlu1 %2028 }
0x13e1   :  { %v1906_v23 = vpack.c.bf16 %v1905_v21, %v1904_v22 }
0x13e2   :  { %2780 = vmatmul.mubr.msk.bf16.vlgmr.msra.gmra.mrb[44].mxu1 %vm752_vm3, %v1785_v18  ;;  %v2114_v18 = vrot.slane %v3554_v15, %v1224_v43 }
0x13e3   :  { %2790 = vmatpush3.bf16.msra.mxu1 %v1908_v20  ;;  %2791 = vmatprep.mubr.msk.bf16.mxu1 %vm3072_vm1, %v3071_v32 }
0x13e4   :  { %2801 = vmatprep.subr.bf16.mxu1 %v3071_v32 }
0x13e5   :  { %v3036_v58 = vpop.eup %3035 }
0x13e6   :  { %v3038_v24 = vpop.eup %3037  ;;  %v2026_v25 = vmul.f32 %v3036_v58, %v3022_v59 }
0x13e7   :  { %v2025_v26 = vmul.f32 %v3038_v24, %v3020_v50 }
0x13e9   :  { %v2027_v27 = vpack.c.bf16 %v2026_v25, %v2025_v26 }
0x13ea   :  { %2792 = vmatmul.mubr.msk.bf16.vlgmr.msra.gmra.mrb[48].mxu1 %vm752_vm3, %v1906_v23 }
0x13eb   :  { %2802 = vmatpush3.bf16.msra.mxu1 %v2029_v4  ;;  %2803 = vmatprep.mubr.msk.bf16.mxu1 %vm3072_vm1, %v3071_v32 }
0x13ec   :  { %2815 = vmatprep.subr.bf16.mxu1 %v3071_v32 }
0x13f2   :  { %2804 = vmatmul.mubr.msk.bf16.vlgmr.msra.gmra.mrb[52].mxu1 %vm752_vm3, %v2027_v27 }
0x13f3   :  { %2819 = vmatprep.mubr.msk.bf16.mxu1 %vm3072_vm1, %v3071_v32 }
0x14a5   :  { %v1705_v28 = vpop.f32.mrb[40].mxu1 }
0x14a6   :  { %v2769_v29 = vpop.f32.mrb[41].mxu1 }
0x14a7   :  { %v1708_v30 = vpop.f32.mrb[42].mxu1 }
0x14a8   :  { %v2770_v31 = vpop.f32.mrb[43].mxu1 }
0x14b5   :  { %v1826_v33 = vpop.f32.mrb[44].mxu1 }
0x14b6   :  { %v2781_v34 = vpop.f32.mrb[45].mxu1 }
0x14b7   :  { %v1829_v35 = vpop.f32.mrb[46].mxu1 }
0x14b8   :  { %v2871_v38 = vpack.i.bf16 %v1829_v35, %v1826_v33  ;;  %v2782_v44 = vpop.f32.mrb[47].mxu1  ;;  %v2958_v35 = vld [vmem:[%s3771_s7 + $0x18] sm:$0xff]  }
0x14ba   :  { %2872 = vrot.lane.b32.xlu0 %v2871_v38, %s3083_s21  ;;  %v2960_v38 = vld [vmem:[%s3772_s8 + $0x28] sm:$0xff]  }
0x14bd   :  { %v1947_v45 = vpop.f32.mrb[48].mxu1 }
0x14be   :  { %v2793_v46 = vpop.f32.mrb[49].mxu1 }
0x14bf   :  { %v1950_v48 = vpop.f32.mrb[50].mxu1 }
0x14c0   :  { %v2876_v49 = vpack.i.bf16 %v1950_v48, %v1947_v45  ;;  %v2794_v50 = vpop.f32.mrb[51].mxu1 }
0x14c1   :  { %v2202_v50 = vrot.slane %v3554_v15, %v1312_v37  ;;  %v2961_v37 = vld [vmem:[%s3772_s8 + $0x30] sm:$0xff]  }
0x14c2   :  { %2877 = vrot.lane.b32.xlu1 %v2876_v49, %s3085_s25 }
0x14c5   :  { %v2068_v51 = vpop.f32.mrb[52].mxu1 }
0x14c6   :  { %v2805_v59 = vpop.f32.mrb[53].mxu1 }
0x14c7   :  { %v2071_v61 = vpop.f32.mrb[54].mxu1  ;;  %v2208_v59 = vrot.slane %v3554_v15, %v1318_v41  ;;  %v2962_v41 = vld [vmem:[%s3772_s8 + $0x38] sm:$0xff]   ;;  %s3088_s8 = smov [#allocation2]  }
0x14c8   :  { %v2881_v62 = vpack.i.bf16 %v2071_v61, %v2068_v51  ;;  %v2806_v63 = vpop.f32.mrb[55].mxu1 }
0x14ca   :  { %2882 = vrot.lane.b32.xlu0 %v2881_v62, %s3086_s26 }
0x152c   :  { %v2873_v0 = vpop.permute.xlu0 %2872 }
0x152d   :  { %v2875_v5 = vunpack.i.h.bf16 %v2873_v0  ;;  %v2874_v6 = vunpack.i.l.bf16 %v2873_v0 }
0x152f   :  { %v2100_v12 = vsel %vm704_vm2, %v1708_v30, %v2875_v5  ;;  %v2099_v57 = vsel %vm704_vm2, %v1705_v28, %v2874_v6 }
0x1534   :  { %v2878_v1 = vpop.permute.xlu1 %2877 }
0x1535   :  { %v2880_v8 = vunpack.i.h.bf16 %v2878_v1  ;;  %v2879_v10 = vunpack.i.l.bf16 %v2878_v1 }
0x1537   :  { %v2102_v60 = vsel %vm752_vm3, %v2100_v12, %v2880_v8  ;;  %v2101_v7 = vsel %vm752_vm3, %v2099_v57, %v2879_v10  ;;  %v2222_v12 = vrot.slane %v3554_v15, %v1341_v2 }
0x153c   :  { %v2883_v11 = vpop.permute.xlu0 %2882 }
0x153d   :  { %v2885_v13 = vunpack.i.h.bf16 %v2883_v11  ;;  %v2884_v14 = vunpack.i.l.bf16 %v2883_v11 }
0x153f   :  { %v2104_v16 = vsel %vm1214_vm4, %v2102_v60, %v2885_v13  ;;  %v2103_v9 = vsel %vm1214_vm4, %v2101_v7, %v2884_v14 }
0x1540   :  { %v2105_v17 = vpack.c.bf16 %v2104_v16, %v2103_v9 }
0x1542   :  { %2812 = vmatmul.mubr.msk.bf16.vlgmr.msra.gmra.mrb[40].mxu0 %vm587_vm0, %v2105_v17 }
0x1543   :  { %2831 = vmatprep.mubr.msk.bf16.mxu0 %vm3072_vm1, %v3071_v32  ;;  %2824 = vmatpush3.bf16.msra.mxu0 %v2959_v36 }
0x1544   :  { %2825 = vmatprep.subr.bf16.mxu0 %v3071_v32 }
0x1547   :  { %2826 = vmatpush3.bf16.msra.mxu0 %v2960_v38 }
0x1548   :  { %2827 = vmatprep.subr.bf16.mxu0 %v3071_v32 }
0x154b   :  { %2828 = vmatpush3.bf16.msra.mxu0 %v2961_v37 }
0x154c   :  { %2829 = vmatprep.subr.bf16.mxu0 %v3071_v32 }
0x154f   :  { %2830 = vmatpush3.bf16.msra.mxu0 %v2962_v41 }
0x1615   :  { %v2164_v19 = vpop.f32.mrb[40].mxu0 }
0x1616   :  { %v2165_v20 = vadd.f32 %v2164_v19, %v2114_v18  ;;  %v2813_v54 = vpop.f32.mrb[41].mxu0 }
0x1617   :  { %v2167_v21 = vpop.f32.mrb[42].mxu0 }
0x1618   :  { %v2168_v22 = vadd.f32 %v2167_v21, %v2114_v18  ;;  %v2814_v23 = vpop.f32.mrb[43].mxu0  ;;  %v2171_v58 = vadd.f32 %v2165_v20, %v3575_v39 }
0x161a   :  { %v2173_v4 = vsel %vm587_vm0, %v2171_v58, 0.0  ;;  %v2172_v24 = vadd.f32 %v2168_v22, %v3578_v3  ;;  %v2957_v3 = vld [vmem:[%s3771_s7 + $0x10] sm:$0xff]  }
0x161b   :  { %2174 = vadd.xlane.f32.xlu1 %v2173_v4  ;;  %2816 = vmatpush3.bf16.msra.mxu1 %v2957_v3 }
0x161c   :  { %v2176_v25 = vsel %vm587_vm0, %v2172_v24, 0.0  ;;  %2817 = vmatprep.subr.bf16.mxu1 %v3071_v32  ;;  %v39_v32 = vld [vmem:[%s3773_s9 + $0x10] sm:$0x7]  ;;  %s2412_s9 = sshll.u32 %s3088_s8, 4  ;;  %s2413_s9 = int_to_ptr.vmem [resolvable:$true] %s2412_s9 }
0x161d   :  { %2177 = vadd.xlane.f32.xlu0 %v2176_v25  ;;  %v2294_v19 = vrot.slane %v39_v32, %v3310_v56  ;;  %v2394_v38 = vrot.slane %v39_v32, %v3338_v40  ;;  %s3047_s11 = scalar_lea.vmem %s2413_s9, 256  ;;  %p3052_p1 = scmp.lt.s32.totalorder %s2413_s9, %s2413_s9 }
0x161e   :  { %p3048_p0 = scmp.ne.s32.totalorder %s2413_s9, %s3047_s11  ;;  %p3053_p2 = scmp.lt.s32.totalorder %s3047_s11, %s3047_s11 }
0x161f   :  { %2818 = vmatpush3.bf16.msra.mxu1 %v2958_v35 }
0x1620   :  { %p3054_p3 = por %p3053_p2, %p3052_p1 }
0x1622   :  { %p3055_p4 = pnand %p3054_p3, %p3048_p0 }
0x16a8   :  { %v2175_v26 = vpop.xlane.xlu1 %2174 }
0x16a9   :  { %v2179_v27 = vmul.f32 0.03125, %v2175_v26 }
0x16aa   :  { %v2178_v28 = vpop.xlane.xlu0 %2177 }
0x16ab   :  { %v2181_v43 = vsub.f32 %v2171_v58, %v2179_v27  ;;  %v2180_v29 = vmul.f32 0.03125, %v2178_v28 }
0x16ad   :  { %v2182_v30 = vsub.f32 %v2172_v24, %v2180_v29  ;;  %v2183_v31 = vmul.f32 %v2181_v43, %v2181_v43 }
0x16af   :  { %v2185_v33 = vsel %vm587_vm0, %v2183_v31, 0.0  ;;  %v2184_v34 = vmul.f32 %v2182_v30, %v2182_v30 }
0x16b0   :  { %2186 = vadd.xlane.f32.xlu0 %v2185_v33 }
0x16b1   :  { %v2188_v39 = vsel %vm587_vm0, %v2184_v34, 0.0 }
0x16b2   :  { %2189 = vadd.xlane.f32.xlu1 %v2188_v39 }
0x173d   :  { %v2187_v44 = vpop.xlane.xlu0 %2186 }
0x173e   :  { %v2191_v45 = vmul.f32 0.03125, %v2187_v44 }
0x173f   :  { %v2190_v46 = vpop.xlane.xlu1 %2189 }
0x1740   :  { %v2193_v47 = vadd.f32 1e-05, %v2191_v45  ;;  %v2192_v48 = vmul.f32 0.03125, %v2190_v46  ;;  %v2400_v45 = vrot.slane %v39_v32, %v3343_v42 }
0x1742   :  { %3039 = vrsqrt.f32 %v2193_v47  ;;  %v2194_v49 = vadd.f32 1e-05, %v2192_v48 }
0x1744   :  { %3041 = vrsqrt.f32 %v2194_v49 }
0x174c   :  { %v3040_v51 = vpop.eup %3039 }
0x174d   :  { %v2197_v61 = vmul.f32 %v3040_v51, %v2181_v43 }
0x174e   :  { %v3042_v62 = vpop.eup %3041 }
0x174f   :  { %v2203_v63 = vmul.f32 %v2202_v50, %v2197_v61  ;;  %v2198_v0 = vmul.f32 %v3042_v62, %v2182_v30 }
0x1751   :  { %v2204_v1 = vmul.f32 %v2202_v50, %v2198_v0  ;;  %v2209_v5 = vadd.f32 %v2208_v59, %v2203_v63 }
0x1753   :  { %v2210_v6 = vadd.f32 %v2208_v59, %v2204_v1  ;;  %v2211_v8 = vmul.f32 %v2209_v5, %v3527_v52 }
0x1755   :  { %v2212_v10 = vmul.f32 %v2210_v6, %v3529_v53 }
0x1757   :  { %v2213_v11 = vpack.c.bf16 %v2212_v10, %v2211_v8 }
0x1759   :  { %2820 = vmatmul.mubr.msk.bf16.vlgmr.msra.gmra.mrb[56].mxu1 %vm587_vm0, %v2213_v11 }
0x182c   :  { %v2272_v57 = vpop.f32.mrb[56].mxu1 }
0x182d   :  { %v2273_v13 = vadd.f32 %v2272_v57, %v2222_v12  ;;  %v2821_v14 = vpop.f32.mrb[57].mxu1 }
0x182e   :  { %v2275_v60 = vpop.f32.mrb[58].mxu1 }
0x182f   :  { %v2276_v7 = vadd.f32 %v2275_v60, %v2222_v12  ;;  %v2822_v16 = vpop.f32.mrb[59].mxu1  ;;  %v2279_v9 = vmax.f32 %v2273_v13, 0.0 }
0x1831   :  { %v2280_v17 = vmax.f32 %v2276_v7, 0.0 }
0x1833   :  { %v2281_v18 = vpack.c.bf16 %v2280_v17, %v2279_v9 }
0x1835   :  { %2832 = vmatmul.mubr.msk.bf16.vlgmr.msra.gmra.mrb[44].mxu0 %vm1438_vm5, %v2281_v18 }
0x1908   :  { %v2356_v55 = vpop.f32.mrb[44].mxu0 }
0x1909   :  { %v2357_v20 = vadd.f32 %v2356_v55, %v2294_v19  ;;  %v2833_v2 = vpop.f32.mrb[45].mxu0 }
0x190a   :  { %v2359_v15 = vpop.f32.mrb[46].mxu0 }
0x190b   :  { %v2360_v54 = vadd.f32 %v2359_v15, %v2294_v19  ;;  %v2834_v21 = vpop.f32.mrb[47].mxu0  ;;  %v2363_v22 = vadd.f32 %v2357_v20, %v2211_v8 }
0x190d   :  { %v2365_v23 = vsel %vm587_vm0, %v2363_v22, 0.0  ;;  %v2364_v58 = vadd.f32 %v2360_v54, %v2212_v10 }
0x190e   :  { %2366 = vadd.xlane.f32.xlu0 %v2365_v23 }
0x190f   :  { %v2368_v4 = vsel %vm587_vm0, %v2364_v58, 0.0 }
0x1910   :  { %2369 = vadd.xlane.f32.xlu1 %v2368_v4 }
0x199b   :  { %v2367_v24 = vpop.xlane.xlu0 %2366 }
0x199c   :  { %v2371_v25 = vmul.f32 0.03125, %v2367_v24 }
0x199d   :  { %v2370_v26 = vpop.xlane.xlu1 %2369 }
0x199e   :  { %v2373_v27 = vsub.f32 %v2363_v22, %v2371_v25  ;;  %v2372_v28 = vmul.f32 0.03125, %v2370_v26 }
0x19a0   :  { %v2374_v56 = vsub.f32 %v2364_v58, %v2372_v28  ;;  %v2375_v43 = vmul.f32 %v2373_v27, %v2373_v27 }
0x19a2   :  { %v2377_v29 = vsel %vm587_vm0, %v2375_v43, 0.0  ;;  %v2376_v30 = vmul.f32 %v2374_v56, %v2374_v56 }
0x19a3   :  { %2378 = vadd.xlane.f32.xlu0 %v2377_v29 }
0x19a4   :  { %v2380_v31 = vsel %vm587_vm0, %v2376_v30, 0.0 }
0x19a5   :  { %2381 = vadd.xlane.f32.xlu1 %v2380_v31 }
0x1a30   :  { %v2379_v33 = vpop.xlane.xlu0 %2378 }
0x1a31   :  { %v2383_v34 = vmul.f32 0.03125, %v2379_v33 }
0x1a32   :  { %v2382_v39 = vpop.xlane.xlu1 %2381 }
0x1a33   :  { %v2385_v3 = vadd.f32 1e-05, %v2383_v34  ;;  %v2384_v35 = vmul.f32 0.03125, %v2382_v39 }
0x1a35   :  { %3043 = vrsqrt.f32 %v2385_v3  ;;  %v2386_v36 = vadd.f32 1e-05, %v2384_v35 }
0x1a37   :  { %3045 = vrsqrt.f32 %v2386_v36 }
0x1a3f   :  { %v3044_v44 = vpop.eup %3043 }
0x1a40   :  { %v2389_v46 = vmul.f32 %v3044_v44, %v2373_v27 }
0x1a41   :  { %v3046_v47 = vpop.eup %3045 }
0x1a42   :  { %v2395_v48 = vmul.f32 %v2394_v38, %v2389_v46  ;;  %v2390_v49 = vmul.f32 %v3046_v47, %v2374_v56 }
0x1a44   :  { %v2396_v50 = vmul.f32 %v2394_v38, %v2390_v49  ;;  %v2401_v51 = vadd.f32 %v2400_v45, %v2395_v48 }
0x1a46   :  { %v2402_v59 = vadd.f32 %v2400_v45, %v2396_v50  ;;  %v2403_v61 = vmul.f32 %v2401_v51, %v3527_v52 }
0x1a48   :  { %v2404_v62 = vmul.f32 %v2402_v59, %v3529_v53  ;;  %2405 = vst.msk [vmem:[#allocation2] sm:$0xff] %vm587_vm0, %v2403_v61 }
0x1a4a   :  { %2406 = vst.msk [vmem:[#allocation2 + $0x8] sm:$0xff] %vm587_vm0, %v2404_v62 }
0x1a4b   :  { %3058 = shalt.err (!%p3055_p4)
}
0x1a4c   :  { %s3059_s14 = scalar_lea.hbm %s3774_s10, 256 }
0x1a4d   :  { %p3060_p5 = scmp.ne.s32.totalorder %s3774_s10, %s3059_s14  ;;  %p3063_p6 = scmp.lt.u32.totalorder %s3059_s14, %s3774_s10 }
0x1a4f   :  { %p3065_p7 = pnand %p3063_p6, %p3060_p5 }
0x1a51   :  { %3068 = shalt.err (!%p3065_p7)
}
0x1a52   :  { %s3089_s3 = smov 128  }
0x1a53   :  { %2418 = dma.vmem_to_hbm [thread:$0]  %s2413_s9, 256, %s3774_s10, [#allocation3], %s3089_s3, %s3089_s3, %s3083_s21  }
0x1a54   :  { %3069 = dma.done.wait [#allocation3], 256  }
0x1a55   :  { %3070 = vsyncadd [#allocation3], 4294967040 }
0x1a56   :  { %2422 = vsyncpa [#allocation3], 1 }

</bundles_post_ra>
